<compile_context>
chip_gen: v6e
topology: v6e:2x2x1
jax: 0.10.0
libtpu: 0.0.40
codegen_flags: <defaults>
</compile_context>

<pallas_src>
import jax
import jax.numpy as jnp
from jax import lax
from jax.experimental import pallas as pl
from jax.experimental.pallas import tpu as pltpu


def _round_up(n, m):
    return ((n + m - 1) // m) * m


def _reorder_gates(w):
    """Permute gate blocks along the last axis from PyTorch order (i, f, g, o) -> (i, f, o, g)."""
    i, f, g, o = jnp.split(w, 4, axis=-1)
    return jnp.concatenate([i, f, o, g], axis=-1)


# ----------------------------------------------------------------------------
# Fused Pallas kernel (all LSTM layers + FC)
# ----------------------------------------------------------------------------
def _make_fused_kernel(T, Bp, I_pad, H, C, num_layers):
    """Build the fused kernel for static shapes / layer count.

    refs layout:
      [0]                  x_ref      (T*Bp, I_pad)   time-major, batch/feature zero-padded
      [1 + l]              packed (l) (in_rows + H + 1, 4H) = [W_ih^T | W_hh^T | b_ih+b_hh]
      [1 + L]              fc_ref     (H + 1, C)      = [fc_w^T | fc_b]
      [2 + L]              out_ref    (Bp, C)
      [3 + L]              hseq_scr   (T*Bp, H)       VMEM scratch (inter-layer hidden sequence)
    Gate order inside all packed weights is (i, f, o, g).
    """

    def kernel(*refs):
        x_ref = refs[0]
        layer_refs = refs[1:1 + num_layers]
        fc_ref = refs[1 + num_layers]
        out_ref = refs[2 + num_layers]
        hseq_scr = refs[3 + num_layers]

        seq = x_ref[...]                                   # (T*Bp, in_dim of current layer)
        h_last = None
        for l in range(num_layers):
            pk = layer_refs[l]
            in_rows = I_pad if l == 0 else H               # static per layer
            wih = pk[0:in_rows, :]                         # (in_rows, 4H)
            whh = pk[in_rows:in_rows + H, :]               # (H, 4H)   loaded once per layer
            b = pk[in_rows + H:in_rows + H + 1, :]         # (1, 4H)   fused b_ih + b_hh

            # Hoisted input projection for ALL timesteps at once, bias folded in.
            gpre = jnp.dot(seq, wih, preferred_element_type=jnp.float32) + b  # (T*Bp, 4H)

            h = jnp.zeros((Bp, H), jnp.float32)
            c = jnp.zeros((Bp, H), jnp.float32)
            last_layer = l == num_layers - 1

            # Serial recurrence: exactly one MXU dot (h @ W_hh) per timestep.
            # T is small and static -> full unroll; all slice offsets are static & 8-aligned.
            for t in range(T):
                gates = gpre[t * Bp:(t + 1) * Bp, :] + jnp.dot(
                    h, whh, preferred_element_type=jnp.float32
                )                                           # (Bp, 4H)
                # Gate order is (i, f, o, g): sigmoid on first 3H, tanh only on last H.
                sig = jax.nn.sigmoid(gates[:, :3 * H])
                g_g = jnp.tanh(gates[:, 3 * H:])
                i_g = sig[:, 0:H]
                f_g = sig[:, H:2 * H]
                o_g = sig[:, 2 * H:3 * H]
                c = f_g * c + i_g * g_g
                h = o_g * jnp.tanh(c)
                if not last_layer:
                    hseq_scr[t * Bp:(t + 1) * Bp, :] = h   # aligned full-tile store, stays in VMEM

            if not last_layer:
                seq = hseq_scr[...]                        # next layer's input sequence
            h_last = h

        # Final FC on the last timestep's hidden state; single (Bp, C) store to HBM.
        fcw = fc_ref[0:H, :]
        fcb = fc_ref[H:H + 1, :]
        out_ref[...] = (
            jnp.dot(h_last, fcw, preferred_element_type=jnp.float32) + fcb
        ).astype(out_ref.dtype)

    return kernel


# ----------------------------------------------------------------------------
# Wrapper
# ----------------------------------------------------------------------------
def eeg_lstm_fc_forward(x, params, hidden_size):
    """Reproduces Eeg_lstm_fc.forward: view -> multi-layer LSTM -> out[:, -1] -> fc."""
    B, T = x.shape[0], x.shape[1]
    x = x.reshape(B, T, -1).astype(jnp.float32)            # x.view(B, seq, -1)
    I = x.shape[-1]
    H = hidden_size
    C = params["fc_w"].shape[0]
    num_layers = len(params["lstm"])

    Bp = _round_up(max(B, 8), 8)                           # pad batch to a full sublane tile
    I_pad = _round_up(max(I, 8), 8)                        # pad layer-0 features to 8 rows

    # Time-major, zero-padded batch + features, flattened to (T*Bp, I_pad).
    x_tb = jnp.transpose(x, (1, 0, 2))                     # (T, B, I)
    x_tb = jnp.pad(x_tb, ((0, 0), (0, Bp - B), (0, I_pad - I)))
    x_tb = x_tb.reshape(T * Bp, I_pad)

    args = [x_tb]
    for li, (w_ih, w_hh, b_ih, b_hh) in enumerate(params["lstm"]):
        in_sz = w_ih.shape[1]
        wihT = _reorder_gates(jnp.transpose(w_ih))         # (in, 4H), gate order (i,f,o,g)
        whhT = _reorder_gates(jnp.transpose(w_hh))         # (H, 4H)
        bias = _reorder_gates((b_ih + b_hh).reshape(1, 4 * H))
        if li == 0 and I_pad > in_sz:
            wihT = jnp.pad(wihT, ((0, I_pad - in_sz), (0, 0)))   # zero rows -> math unchanged
        args.append(jnp.concatenate([wihT, whhT, bias], axis=0))  # one packed array per layer
    args.append(jnp.concatenate(
        [jnp.transpose(params["fc_w"]), params["fc_b"].reshape(1, C)], axis=0))  # (H+1, C)
    # TODO(synk): nn.LSTM inter-layer dropout omitted (inference/eval semantics).

    kernel = _make_fused_kernel(T, Bp, I_pad, H, C, num_layers)
    vmem = pltpu.MemorySpace.VMEM
    out = pl.pallas_call(
        kernel,
        out_shape=jax.ShapeDtypeStruct((Bp, C), jnp.float32),
        in_specs=[pl.BlockSpec(memory_space=vmem)] * len(args),
        out_specs=pl.BlockSpec(memory_space=vmem),
        scratch_shapes=[pltpu.VMEM((T * Bp, H), jnp.float32)],   # inter-layer hidden sequence
        compiler_params=pltpu.CompilerParams(vmem_limit_bytes=32 * 1024 * 1024),
    )(*args)
    return out[:B]                                          # drop padded batch rows


# ----------------------------------------------------------------------------
# Deterministic parameter init (shapes match nn.LSTM / nn.Linear)
# ----------------------------------------------------------------------------
def init_params(key, num_channels, hidden_size, num_layers, num_classes):
    k = 1.0 / jnp.sqrt(hidden_size)
    params = {"lstm": []}
    for layer in range(num_layers):
        in_sz = num_channels if layer == 0 else hidden_size
        key, k1, k2, k3, k4 = jax.random.split(key, 5)
        w_ih = jax.random.uniform(k1, (4 * hidden_size, in_sz), jnp.float32, -k, k)
        w_hh = jax.random.uniform(k2, (4 * hidden_size, hidden_size), jnp.float32, -k, k)
        b_ih = jax.random.uniform(k3, (4 * hidden_size,), jnp.float32, -k, k)
        b_hh = jax.random.uniform(k4, (4 * hidden_size,), jnp.float32, -k, k)
        params["lstm"].append((w_ih, w_hh, b_ih, b_hh))
    key, k5, k6 = jax.random.split(key, 3)
    kf = 1.0 / jnp.sqrt(hidden_size)
    params["fc_w"] = jax.random.uniform(k5, (num_classes, hidden_size), jnp.float32, -kf, kf)
    params["fc_b"] = jax.random.uniform(k6, (num_classes,), jnp.float32, -kf, kf)
    return params


# ----------------------------------------------------------------------------
# Pure-JAX reference (for correctness check) — PyTorch gate order (i, f, g, o)
# ----------------------------------------------------------------------------
def reference_forward(x, params, hidden_size):
    B = x.shape[0]
    x = x.reshape(B, x.shape[1], -1).astype(jnp.float32)
    h_seq = x
    for (w_ih, w_hh, b_ih, b_hh) in params["lstm"]:
        def step(carry, x_t):
            h, c = carry
            gates = x_t @ w_ih.T + b_ih + h @ w_hh.T + b_hh
            i, f, g, o = jnp.split(gates, 4, axis=-1)
            i, f, o = jax.nn.sigmoid(i), jax.nn.sigmoid(f), jax.nn.sigmoid(o)
            g = jnp.tanh(g)
            c = f * c + i * g
            h = o * jnp.tanh(c)
            return (h, c), h
        h0 = jnp.zeros((B, hidden_size), jnp.float32)
        c0 = jnp.zeros((B, hidden_size), jnp.float32)
        _, ys = lax.scan(step, (h0, c0), jnp.transpose(h_seq, (1, 0, 2)))
        h_seq = jnp.transpose(ys, (1, 0, 2))
    return h_seq[:, -1, :] @ params["fc_w"].T + params["fc_b"]


# ----------------------------------------------------------------------------
if __name__ == "__main__":
    # Small config: num_channels=4 (2x2 spatial flattens to 4), seq_length=8,
    # hidden_size=32, num_layers=2, num_classes=4, batch=2.
    num_channels, seq_length, hidden_size, num_layers, num_classes = 4, 8, 32, 2, 4

    key = jax.random.PRNGKey(0)
    key, xkey = jax.random.split(key)
    # Input (B, seq, 2, 2) -> view flattens trailing dims to num_channels=4.
    x = jax.random.normal(xkey, (2, seq_length, 2, 2), dtype=jnp.float32)

    params = init_params(key, num_channels, hidden_size, num_layers, num_classes)

    fwd = jax.jit(eeg_lstm_fc_forward, static_argnums=(2,))
    out = jax.block_until_ready(fwd(x, params, hidden_size))

    ref = jax.block_until_ready(reference_forward(x, params, hidden_size))
    assert out.shape == (2, num_classes)
    assert jnp.allclose(out, ref, atol=1e-4, rtol=1e-4), (out, ref)

    print("KERNEL_OK")
</pallas_src>

<mosaic_0001>
module attributes {stable_mosaic.version = 11 : i64} {
  func.func @kernel(%arg0: memref<64x8xf32, #tpu.memory_space<vmem>>, %arg1: memref<41x128xf32, #tpu.memory_space<vmem>>, %arg2: memref<65x128xf32, #tpu.memory_space<vmem>>, %arg3: memref<33x4xf32, #tpu.memory_space<vmem>>, %arg4: memref<8x4xf32, #tpu.memory_space<vmem>>, %arg5: memref<64x32xf32, #tpu.memory_space<vmem>>) attributes {dimension_semantics = [], scalar_prefetch = 0 : i64, scratch_operands = 1 : i64, tpu.core_type = #tpu.core_type<tc>} {
    %c0 = arith.constant 0 : index
    %c0_0 = arith.constant 0 : index
    %0 = vector.load %arg0[%c0, %c0_0] : memref<64x8xf32, #tpu.memory_space<vmem>>, vector<64x8xf32>
    %c0_1 = arith.constant 0 : index
    %c0_2 = arith.constant 0 : index
    %1 = vector.load %arg1[%c0_1, %c0_2] : memref<41x128xf32, #tpu.memory_space<vmem>>, vector<8x128xf32>
    %c8 = arith.constant 8 : index
    %c0_3 = arith.constant 0 : index
    %2 = vector.load %arg1[%c8, %c0_3] : memref<41x128xf32, #tpu.memory_space<vmem>>, vector<32x128xf32>
    %c40 = arith.constant 40 : index
    %c0_4 = arith.constant 0 : index
    %3 = vector.load %arg1[%c40, %c0_4] : memref<41x128xf32, #tpu.memory_space<vmem>>, vector<1x128xf32>
    %cst = arith.constant dense<0.000000e+00> : vector<64x128xf32>
    %4 = tpu.matmul %0, %1, %cst {dimension_numbers = #tpu.dot_dimension_numbers<[1], [0], [0], [1], [0, 0, 1, 1], [], []>} : vector<64x8xf32>, vector<8x128xf32>, vector<64x128xf32> -> vector<64x128xf32>
    %5 = vector.broadcast %3 : vector<1x128xf32> to vector<64x128xf32>
    %6 = arith.addf %4, %5 : vector<64x128xf32>
    %cst_5 = arith.constant 0.000000e+00 : f32
    %7 = vector.broadcast %cst_5 : f32 to vector<8x32xf32>
    %cst_6 = arith.constant 0.000000e+00 : f32
    %8 = vector.broadcast %cst_6 : f32 to vector<8x32xf32>
    %9 = vector.extract_strided_slice %6 {offsets = [0, 0], sizes = [8, 128], strides = [1, 1]} : vector<64x128xf32> to vector<8x128xf32>
    %cst_7 = arith.constant dense<0.000000e+00> : vector<8x128xf32>
    %10 = tpu.matmul %7, %2, %cst_7 {dimension_numbers = #tpu.dot_dimension_numbers<[1], [0], [0], [1], [0, 0, 1, 1], [], []>} : vector<8x32xf32>, vector<32x128xf32>, vector<8x128xf32> -> vector<8x128xf32>
    %11 = arith.addf %9, %10 : vector<8x128xf32>
    %12 = vector.extract_strided_slice %11 {offsets = [0, 0], sizes = [8, 96], strides = [1, 1]} : vector<8x128xf32> to vector<8x96xf32>
    %13 = arith.negf %12 : vector<8x96xf32>
    %14 = math.exp %13 : vector<8x96xf32>
    %cst_8 = arith.constant 1.000000e+00 : f32
    %15 = vector.broadcast %cst_8 : f32 to vector<8x96xf32>
    %16 = arith.addf %15, %14 : vector<8x96xf32>
    %17 = arith.divf %15, %16 : vector<8x96xf32>
    %18 = vector.extract_strided_slice %11 {offsets = [0, 96], sizes = [8, 32], strides = [1, 1]} : vector<8x128xf32> to vector<8x32xf32>
    %19 = math.tanh %18 : vector<8x32xf32>
    %20 = vector.extract_strided_slice %17 {offsets = [0, 0], sizes = [8, 32], strides = [1, 1]} : vector<8x96xf32> to vector<8x32xf32>
    %21 = vector.extract_strided_slice %17 {offsets = [0, 32], sizes = [8, 32], strides = [1, 1]} : vector<8x96xf32> to vector<8x32xf32>
    %22 = vector.extract_strided_slice %17 {offsets = [0, 64], sizes = [8, 32], strides = [1, 1]} : vector<8x96xf32> to vector<8x32xf32>
    %23 = arith.mulf %21, %8 : vector<8x32xf32>
    %24 = arith.mulf %20, %19 : vector<8x32xf32>
    %25 = arith.addf %23, %24 : vector<8x32xf32>
    %26 = math.tanh %25 : vector<8x32xf32>
    %27 = arith.mulf %22, %26 : vector<8x32xf32>
    %c0_9 = arith.constant 0 : index
    %c0_10 = arith.constant 0 : index
    %28 = vector.load %arg5[%c0_9, %c0_10] : memref<64x32xf32, #tpu.memory_space<vmem>>, vector<8x32xf32>
    tpu.vector_store %arg5[%c0_9, %c0_10], %27 {strides = array<i32>} : memref<64x32xf32, #tpu.memory_space<vmem>>, vector<8x32xf32>,
    %29 = vector.extract_strided_slice %6 {offsets = [8, 0], sizes = [8, 128], strides = [1, 1]} : vector<64x128xf32> to vector<8x128xf32>
    %cst_11 = arith.constant dense<0.000000e+00> : vector<8x128xf32>
    %30 = tpu.matmul %27, %2, %cst_11 {dimension_numbers = #tpu.dot_dimension_numbers<[1], [0], [0], [1], [0, 0, 1, 1], [], []>} : vector<8x32xf32>, vector<32x128xf32>, vector<8x128xf32> -> vector<8x128xf32>
    %31 = arith.addf %29, %30 : vector<8x128xf32>
    %32 = vector.extract_strided_slice %31 {offsets = [0, 0], sizes = [8, 96], strides = [1, 1]} : vector<8x128xf32> to vector<8x96xf32>
    %33 = arith.negf %32 : vector<8x96xf32>
    %34 = math.exp %33 : vector<8x96xf32>
    %cst_12 = arith.constant 1.000000e+00 : f32
    %35 = vector.broadcast %cst_12 : f32 to vector<8x96xf32>
    %36 = arith.addf %35, %34 : vector<8x96xf32>
    %37 = arith.divf %35, %36 : vector<8x96xf32>
    %38 = vector.extract_strided_slice %31 {offsets = [0, 96], sizes = [8, 32], strides = [1, 1]} : vector<8x128xf32> to vector<8x32xf32>
    %39 = math.tanh %38 : vector<8x32xf32>
    %40 = vector.extract_strided_slice %37 {offsets = [0, 0], sizes = [8, 32], strides = [1, 1]} : vector<8x96xf32> to vector<8x32xf32>
    %41 = vector.extract_strided_slice %37 {offsets = [0, 32], sizes = [8, 32], strides = [1, 1]} : vector<8x96xf32> to vector<8x32xf32>
    %42 = vector.extract_strided_slice %37 {offsets = [0, 64], sizes = [8, 32], strides = [1, 1]} : vector<8x96xf32> to vector<8x32xf32>
    %43 = arith.mulf %41, %25 : vector<8x32xf32>
    %44 = arith.mulf %40, %39 : vector<8x32xf32>
    %45 = arith.addf %43, %44 : vector<8x32xf32>
    %46 = math.tanh %45 : vector<8x32xf32>
    %47 = arith.mulf %42, %46 : vector<8x32xf32>
    %c8_13 = arith.constant 8 : index
    %c0_14 = arith.constant 0 : index
    %48 = vector.load %arg5[%c8_13, %c0_14] : memref<64x32xf32, #tpu.memory_space<vmem>>, vector<8x32xf32>
    tpu.vector_store %arg5[%c8_13, %c0_14], %47 {strides = array<i32>} : memref<64x32xf32, #tpu.memory_space<vmem>>, vector<8x32xf32>,
    %49 = vector.extract_strided_slice %6 {offsets = [16, 0], sizes = [8, 128], strides = [1, 1]} : vector<64x128xf32> to vector<8x128xf32>
    %cst_15 = arith.constant dense<0.000000e+00> : vector<8x128xf32>
    %50 = tpu.matmul %47, %2, %cst_15 {dimension_numbers = #tpu.dot_dimension_numbers<[1], [0], [0], [1], [0, 0, 1, 1], [], []>} : vector<8x32xf32>, vector<32x128xf32>, vector<8x128xf32> -> vector<8x128xf32>
    %51 = arith.addf %49, %50 : vector<8x128xf32>
    %52 = vector.extract_strided_slice %51 {offsets = [0, 0], sizes = [8, 96], strides = [1, 1]} : vector<8x128xf32> to vector<8x96xf32>
    %53 = arith.negf %52 : vector<8x96xf32>
    %54 = math.exp %53 : vector<8x96xf32>
    %cst_16 = arith.constant 1.000000e+00 : f32
    %55 = vector.broadcast %cst_16 : f32 to vector<8x96xf32>
    %56 = arith.addf %55, %54 : vector<8x96xf32>
    %57 = arith.divf %55, %56 : vector<8x96xf32>
    %58 = vector.extract_strided_slice %51 {offsets = [0, 96], sizes = [8, 32], strides = [1, 1]} : vector<8x128xf32> to vector<8x32xf32>
    %59 = math.tanh %58 : vector<8x32xf32>
    %60 = vector.extract_strided_slice %57 {offsets = [0, 0], sizes = [8, 32], strides = [1, 1]} : vector<8x96xf32> to vector<8x32xf32>
    %61 = vector.extract_strided_slice %57 {offsets = [0, 32], sizes = [8, 32], strides = [1, 1]} : vector<8x96xf32> to vector<8x32xf32>
    %62 = vector.extract_strided_slice %57 {offsets = [0, 64], sizes = [8, 32], strides = [1, 1]} : vector<8x96xf32> to vector<8x32xf32>
    %63 = arith.mulf %61, %45 : vector<8x32xf32>
    %64 = arith.mulf %60, %59 : vector<8x32xf32>
    %65 = arith.addf %63, %64 : vector<8x32xf32>
    %66 = math.tanh %65 : vector<8x32xf32>
    %67 = arith.mulf %62, %66 : vector<8x32xf32>
    %c16 = arith.constant 16 : index
    %c0_17 = arith.constant 0 : index
    %68 = vector.load %arg5[%c16, %c0_17] : memref<64x32xf32, #tpu.memory_space<vmem>>, vector<8x32xf32>
    tpu.vector_store %arg5[%c16, %c0_17], %67 {strides = array<i32>} : memref<64x32xf32, #tpu.memory_space<vmem>>, vector<8x32xf32>,
    %69 = vector.extract_strided_slice %6 {offsets = [24, 0], sizes = [8, 128], strides = [1, 1]} : vector<64x128xf32> to vector<8x128xf32>
    %cst_18 = arith.constant dense<0.000000e+00> : vector<8x128xf32>
    %70 = tpu.matmul %67, %2, %cst_18 {dimension_numbers = #tpu.dot_dimension_numbers<[1], [0], [0], [1], [0, 0, 1, 1], [], []>} : vector<8x32xf32>, vector<32x128xf32>, vector<8x128xf32> -> vector<8x128xf32>
    %71 = arith.addf %69, %70 : vector<8x128xf32>
    %72 = vector.extract_strided_slice %71 {offsets = [0, 0], sizes = [8, 96], strides = [1, 1]} : vector<8x128xf32> to vector<8x96xf32>
    %73 = arith.negf %72 : vector<8x96xf32>
    %74 = math.exp %73 : vector<8x96xf32>
    %cst_19 = arith.constant 1.000000e+00 : f32
    %75 = vector.broadcast %cst_19 : f32 to vector<8x96xf32>
    %76 = arith.addf %75, %74 : vector<8x96xf32>
    %77 = arith.divf %75, %76 : vector<8x96xf32>
    %78 = vector.extract_strided_slice %71 {offsets = [0, 96], sizes = [8, 32], strides = [1, 1]} : vector<8x128xf32> to vector<8x32xf32>
    %79 = math.tanh %78 : vector<8x32xf32>
    %80 = vector.extract_strided_slice %77 {offsets = [0, 0], sizes = [8, 32], strides = [1, 1]} : vector<8x96xf32> to vector<8x32xf32>
    %81 = vector.extract_strided_slice %77 {offsets = [0, 32], sizes = [8, 32], strides = [1, 1]} : vector<8x96xf32> to vector<8x32xf32>
    %82 = vector.extract_strided_slice %77 {offsets = [0, 64], sizes = [8, 32], strides = [1, 1]} : vector<8x96xf32> to vector<8x32xf32>
    %83 = arith.mulf %81, %65 : vector<8x32xf32>
    %84 = arith.mulf %80, %79 : vector<8x32xf32>
    %85 = arith.addf %83, %84 : vector<8x32xf32>
    %86 = math.tanh %85 : vector<8x32xf32>
    %87 = arith.mulf %82, %86 : vector<8x32xf32>
    %c24 = arith.constant 24 : index
    %c0_20 = arith.constant 0 : index
    %88 = vector.load %arg5[%c24, %c0_20] : memref<64x32xf32, #tpu.memory_space<vmem>>, vector<8x32xf32>
    tpu.vector_store %arg5[%c24, %c0_20], %87 {strides = array<i32>} : memref<64x32xf32, #tpu.memory_space<vmem>>, vector<8x32xf32>,
    %89 = vector.extract_strided_slice %6 {offsets = [32, 0], sizes = [8, 128], strides = [1, 1]} : vector<64x128xf32> to vector<8x128xf32>
    %cst_21 = arith.constant dense<0.000000e+00> : vector<8x128xf32>
    %90 = tpu.matmul %87, %2, %cst_21 {dimension_numbers = #tpu.dot_dimension_numbers<[1], [0], [0], [1], [0, 0, 1, 1], [], []>} : vector<8x32xf32>, vector<32x128xf32>, vector<8x128xf32> -> vector<8x128xf32>
    %91 = arith.addf %89, %90 : vector<8x128xf32>
    %92 = vector.extract_strided_slice %91 {offsets = [0, 0], sizes = [8, 96], strides = [1, 1]} : vector<8x128xf32> to vector<8x96xf32>
    %93 = arith.negf %92 : vector<8x96xf32>
    %94 = math.exp %93 : vector<8x96xf32>
    %cst_22 = arith.constant 1.000000e+00 : f32
    %95 = vector.broadcast %cst_22 : f32 to vector<8x96xf32>
    %96 = arith.addf %95, %94 : vector<8x96xf32>
    %97 = arith.divf %95, %96 : vector<8x96xf32>
    %98 = vector.extract_strided_slice %91 {offsets = [0, 96], sizes = [8, 32], strides = [1, 1]} : vector<8x128xf32> to vector<8x32xf32>
    %99 = math.tanh %98 : vector<8x32xf32>
    %100 = vector.extract_strided_slice %97 {offsets = [0, 0], sizes = [8, 32], strides = [1, 1]} : vector<8x96xf32> to vector<8x32xf32>
    %101 = vector.extract_strided_slice %97 {offsets = [0, 32], sizes = [8, 32], strides = [1, 1]} : vector<8x96xf32> to vector<8x32xf32>
    %102 = vector.extract_strided_slice %97 {offsets = [0, 64], sizes = [8, 32], strides = [1, 1]} : vector<8x96xf32> to vector<8x32xf32>
    %103 = arith.mulf %101, %85 : vector<8x32xf32>
    %104 = arith.mulf %100, %99 : vector<8x32xf32>
    %105 = arith.addf %103, %104 : vector<8x32xf32>
    %106 = math.tanh %105 : vector<8x32xf32>
    %107 = arith.mulf %102, %106 : vector<8x32xf32>
    %c32 = arith.constant 32 : index
    %c0_23 = arith.constant 0 : index
    %108 = vector.load %arg5[%c32, %c0_23] : memref<64x32xf32, #tpu.memory_space<vmem>>, vector<8x32xf32>
    tpu.vector_store %arg5[%c32, %c0_23], %107 {strides = array<i32>} : memref<64x32xf32, #tpu.memory_space<vmem>>, vector<8x32xf32>,
    %109 = vector.extract_strided_slice %6 {offsets = [40, 0], sizes = [8, 128], strides = [1, 1]} : vector<64x128xf32> to vector<8x128xf32>
    %cst_24 = arith.constant dense<0.000000e+00> : vector<8x128xf32>
    %110 = tpu.matmul %107, %2, %cst_24 {dimension_numbers = #tpu.dot_dimension_numbers<[1], [0], [0], [1], [0, 0, 1, 1], [], []>} : vector<8x32xf32>, vector<32x128xf32>, vector<8x128xf32> -> vector<8x128xf32>
    %111 = arith.addf %109, %110 : vector<8x128xf32>
    %112 = vector.extract_strided_slice %111 {offsets = [0, 0], sizes = [8, 96], strides = [1, 1]} : vector<8x128xf32> to vector<8x96xf32>
    %113 = arith.negf %112 : vector<8x96xf32>
    %114 = math.exp %113 : vector<8x96xf32>
    %cst_25 = arith.constant 1.000000e+00 : f32
    %115 = vector.broadcast %cst_25 : f32 to vector<8x96xf32>
    %116 = arith.addf %115, %114 : vector<8x96xf32>
    %117 = arith.divf %115, %116 : vector<8x96xf32>
    %118 = vector.extract_strided_slice %111 {offsets = [0, 96], sizes = [8, 32], strides = [1, 1]} : vector<8x128xf32> to vector<8x32xf32>
    %119 = math.tanh %118 : vector<8x32xf32>
    %120 = vector.extract_strided_slice %117 {offsets = [0, 0], sizes = [8, 32], strides = [1, 1]} : vector<8x96xf32> to vector<8x32xf32>
    %121 = vector.extract_strided_slice %117 {offsets = [0, 32], sizes = [8, 32], strides = [1, 1]} : vector<8x96xf32> to vector<8x32xf32>
    %122 = vector.extract_strided_slice %117 {offsets = [0, 64], sizes = [8, 32], strides = [1, 1]} : vector<8x96xf32> to vector<8x32xf32>
    %123 = arith.mulf %121, %105 : vector<8x32xf32>
    %124 = arith.mulf %120, %119 : vector<8x32xf32>
    %125 = arith.addf %123, %124 : vector<8x32xf32>
    %126 = math.tanh %125 : vector<8x32xf32>
    %127 = arith.mulf %122, %126 : vector<8x32xf32>
    %c40_26 = arith.constant 40 : index
    %c0_27 = arith.constant 0 : index
    %128 = vector.load %arg5[%c40_26, %c0_27] : memref<64x32xf32, #tpu.memory_space<vmem>>, vector<8x32xf32>
    tpu.vector_store %arg5[%c40_26, %c0_27], %127 {strides = array<i32>} : memref<64x32xf32, #tpu.memory_space<vmem>>, vector<8x32xf32>,
    %129 = vector.extract_strided_slice %6 {offsets = [48, 0], sizes = [8, 128], strides = [1, 1]} : vector<64x128xf32> to vector<8x128xf32>
    %cst_28 = arith.constant dense<0.000000e+00> : vector<8x128xf32>
    %130 = tpu.matmul %127, %2, %cst_28 {dimension_numbers = #tpu.dot_dimension_numbers<[1], [0], [0], [1], [0, 0, 1, 1], [], []>} : vector<8x32xf32>, vector<32x128xf32>, vector<8x128xf32> -> vector<8x128xf32>
    %131 = arith.addf %129, %130 : vector<8x128xf32>
    %132 = vector.extract_strided_slice %131 {offsets = [0, 0], sizes = [8, 96], strides = [1, 1]} : vector<8x128xf32> to vector<8x96xf32>
    %133 = arith.negf %132 : vector<8x96xf32>
    %134 = math.exp %133 : vector<8x96xf32>
    %cst_29 = arith.constant 1.000000e+00 : f32
    %135 = vector.broadcast %cst_29 : f32 to vector<8x96xf32>
    %136 = arith.addf %135, %134 : vector<8x96xf32>
    %137 = arith.divf %135, %136 : vector<8x96xf32>
    %138 = vector.extract_strided_slice %131 {offsets = [0, 96], sizes = [8, 32], strides = [1, 1]} : vector<8x128xf32> to vector<8x32xf32>
    %139 = math.tanh %138 : vector<8x32xf32>
    %140 = vector.extract_strided_slice %137 {offsets = [0, 0], sizes = [8, 32], strides = [1, 1]} : vector<8x96xf32> to vector<8x32xf32>
    %141 = vector.extract_strided_slice %137 {offsets = [0, 32], sizes = [8, 32], strides = [1, 1]} : vector<8x96xf32> to vector<8x32xf32>
    %142 = vector.extract_strided_slice %137 {offsets = [0, 64], sizes = [8, 32], strides = [1, 1]} : vector<8x96xf32> to vector<8x32xf32>
    %143 = arith.mulf %141, %125 : vector<8x32xf32>
    %144 = arith.mulf %140, %139 : vector<8x32xf32>
    %145 = arith.addf %143, %144 : vector<8x32xf32>
    %146 = math.tanh %145 : vector<8x32xf32>
    %147 = arith.mulf %142, %146 : vector<8x32xf32>
    %c48 = arith.constant 48 : index
    %c0_30 = arith.constant 0 : index
    %148 = vector.load %arg5[%c48, %c0_30] : memref<64x32xf32, #tpu.memory_space<vmem>>, vector<8x32xf32>
    tpu.vector_store %arg5[%c48, %c0_30], %147 {strides = array<i32>} : memref<64x32xf32, #tpu.memory_space<vmem>>, vector<8x32xf32>,
    %149 = vector.extract_strided_slice %6 {offsets = [56, 0], sizes = [8, 128], strides = [1, 1]} : vector<64x128xf32> to vector<8x128xf32>
    %cst_31 = arith.constant dense<0.000000e+00> : vector<8x128xf32>
    %150 = tpu.matmul %147, %2, %cst_31 {dimension_numbers = #tpu.dot_dimension_numbers<[1], [0], [0], [1], [0, 0, 1, 1], [], []>} : vector<8x32xf32>, vector<32x128xf32>, vector<8x128xf32> -> vector<8x128xf32>
    %151 = arith.addf %149, %150 : vector<8x128xf32>
    %152 = vector.extract_strided_slice %151 {offsets = [0, 0], sizes = [8, 96], strides = [1, 1]} : vector<8x128xf32> to vector<8x96xf32>
    %153 = arith.negf %152 : vector<8x96xf32>
    %154 = math.exp %153 : vector<8x96xf32>
    %cst_32 = arith.constant 1.000000e+00 : f32
    %155 = vector.broadcast %cst_32 : f32 to vector<8x96xf32>
    %156 = arith.addf %155, %154 : vector<8x96xf32>
    %157 = arith.divf %155, %156 : vector<8x96xf32>
    %158 = vector.extract_strided_slice %151 {offsets = [0, 96], sizes = [8, 32], strides = [1, 1]} : vector<8x128xf32> to vector<8x32xf32>
    %159 = math.tanh %158 : vector<8x32xf32>
    %160 = vector.extract_strided_slice %157 {offsets = [0, 0], sizes = [8, 32], strides = [1, 1]} : vector<8x96xf32> to vector<8x32xf32>
    %161 = vector.extract_strided_slice %157 {offsets = [0, 32], sizes = [8, 32], strides = [1, 1]} : vector<8x96xf32> to vector<8x32xf32>
    %162 = vector.extract_strided_slice %157 {offsets = [0, 64], sizes = [8, 32], strides = [1, 1]} : vector<8x96xf32> to vector<8x32xf32>
    %163 = arith.mulf %161, %145 : vector<8x32xf32>
    %164 = arith.mulf %160, %159 : vector<8x32xf32>
    %165 = arith.addf %163, %164 : vector<8x32xf32>
    %166 = math.tanh %165 : vector<8x32xf32>
    %167 = arith.mulf %162, %166 : vector<8x32xf32>
    %c56 = arith.constant 56 : index
    %c0_33 = arith.constant 0 : index
    %168 = vector.load %arg5[%c56, %c0_33] : memref<64x32xf32, #tpu.memory_space<vmem>>, vector<8x32xf32>
    tpu.vector_store %arg5[%c56, %c0_33], %167 {strides = array<i32>} : memref<64x32xf32, #tpu.memory_space<vmem>>, vector<8x32xf32>,
    %c0_34 = arith.constant 0 : index
    %c0_35 = arith.constant 0 : index
    %169 = vector.load %arg5[%c0_34, %c0_35] : memref<64x32xf32, #tpu.memory_space<vmem>>, vector<64x32xf32>
    %c0_36 = arith.constant 0 : index
    %c0_37 = arith.constant 0 : index
    %170 = vector.load %arg2[%c0_36, %c0_37] : memref<65x128xf32, #tpu.memory_space<vmem>>, vector<32x128xf32>
    %c32_38 = arith.constant 32 : index
    %c0_39 = arith.constant 0 : index
    %171 = vector.load %arg2[%c32_38, %c0_39] : memref<65x128xf32, #tpu.memory_space<vmem>>, vector<32x128xf32>
    %c64 = arith.constant 64 : index
    %c0_40 = arith.constant 0 : index
    %172 = vector.load %arg2[%c64, %c0_40] : memref<65x128xf32, #tpu.memory_space<vmem>>, vector<1x128xf32>
    %cst_41 = arith.constant dense<0.000000e+00> : vector<64x128xf32>
    %173 = tpu.matmul %169, %170, %cst_41 {dimension_numbers = #tpu.dot_dimension_numbers<[1], [0], [0], [1], [0, 0, 1, 1], [], []>} : vector<64x32xf32>, vector<32x128xf32>, vector<64x128xf32> -> vector<64x128xf32>
    %174 = vector.broadcast %172 : vector<1x128xf32> to vector<64x128xf32>
    %175 = arith.addf %173, %174 : vector<64x128xf32>
    %cst_42 = arith.constant 0.000000e+00 : f32
    %176 = vector.broadcast %cst_42 : f32 to vector<8x32xf32>
    %cst_43 = arith.constant 0.000000e+00 : f32
    %177 = vector.broadcast %cst_43 : f32 to vector<8x32xf32>
    %178 = vector.extract_strided_slice %175 {offsets = [0, 0], sizes = [8, 128], strides = [1, 1]} : vector<64x128xf32> to vector<8x128xf32>
    %cst_44 = arith.constant dense<0.000000e+00> : vector<8x128xf32>
    %179 = tpu.matmul %176, %171, %cst_44 {dimension_numbers = #tpu.dot_dimension_numbers<[1], [0], [0], [1], [0, 0, 1, 1], [], []>} : vector<8x32xf32>, vector<32x128xf32>, vector<8x128xf32> -> vector<8x128xf32>
    %180 = arith.addf %178, %179 : vector<8x128xf32>
    %181 = vector.extract_strided_slice %180 {offsets = [0, 0], sizes = [8, 96], strides = [1, 1]} : vector<8x128xf32> to vector<8x96xf32>
    %182 = arith.negf %181 : vector<8x96xf32>
    %183 = math.exp %182 : vector<8x96xf32>
    %cst_45 = arith.constant 1.000000e+00 : f32
    %184 = vector.broadcast %cst_45 : f32 to vector<8x96xf32>
    %185 = arith.addf %184, %183 : vector<8x96xf32>
    %186 = arith.divf %184, %185 : vector<8x96xf32>
    %187 = vector.extract_strided_slice %180 {offsets = [0, 96], sizes = [8, 32], strides = [1, 1]} : vector<8x128xf32> to vector<8x32xf32>
    %188 = math.tanh %187 : vector<8x32xf32>
    %189 = vector.extract_strided_slice %186 {offsets = [0, 0], sizes = [8, 32], strides = [1, 1]} : vector<8x96xf32> to vector<8x32xf32>
    %190 = vector.extract_strided_slice %186 {offsets = [0, 32], sizes = [8, 32], strides = [1, 1]} : vector<8x96xf32> to vector<8x32xf32>
    %191 = vector.extract_strided_slice %186 {offsets = [0, 64], sizes = [8, 32], strides = [1, 1]} : vector<8x96xf32> to vector<8x32xf32>
    %192 = arith.mulf %190, %177 : vector<8x32xf32>
    %193 = arith.mulf %189, %188 : vector<8x32xf32>
    %194 = arith.addf %192, %193 : vector<8x32xf32>
    %195 = math.tanh %194 : vector<8x32xf32>
    %196 = arith.mulf %191, %195 : vector<8x32xf32>
    %197 = vector.extract_strided_slice %175 {offsets = [8, 0], sizes = [8, 128], strides = [1, 1]} : vector<64x128xf32> to vector<8x128xf32>
    %cst_46 = arith.constant dense<0.000000e+00> : vector<8x128xf32>
    %198 = tpu.matmul %196, %171, %cst_46 {dimension_numbers = #tpu.dot_dimension_numbers<[1], [0], [0], [1], [0, 0, 1, 1], [], []>} : vector<8x32xf32>, vector<32x128xf32>, vector<8x128xf32> -> vector<8x128xf32>
    %199 = arith.addf %197, %198 : vector<8x128xf32>
    %200 = vector.extract_strided_slice %199 {offsets = [0, 0], sizes = [8, 96], strides = [1, 1]} : vector<8x128xf32> to vector<8x96xf32>
    %201 = arith.negf %200 : vector<8x96xf32>
    %202 = math.exp %201 : vector<8x96xf32>
    %cst_47 = arith.constant 1.000000e+00 : f32
    %203 = vector.broadcast %cst_47 : f32 to vector<8x96xf32>
    %204 = arith.addf %203, %202 : vector<8x96xf32>
    %205 = arith.divf %203, %204 : vector<8x96xf32>
    %206 = vector.extract_strided_slice %199 {offsets = [0, 96], sizes = [8, 32], strides = [1, 1]} : vector<8x128xf32> to vector<8x32xf32>
    %207 = math.tanh %206 : vector<8x32xf32>
    %208 = vector.extract_strided_slice %205 {offsets = [0, 0], sizes = [8, 32], strides = [1, 1]} : vector<8x96xf32> to vector<8x32xf32>
    %209 = vector.extract_strided_slice %205 {offsets = [0, 32], sizes = [8, 32], strides = [1, 1]} : vector<8x96xf32> to vector<8x32xf32>
    %210 = vector.extract_strided_slice %205 {offsets = [0, 64], sizes = [8, 32], strides = [1, 1]} : vector<8x96xf32> to vector<8x32xf32>
    %211 = arith.mulf %209, %194 : vector<8x32xf32>
    %212 = arith.mulf %208, %207 : vector<8x32xf32>
    %213 = arith.addf %211, %212 : vector<8x32xf32>
    %214 = math.tanh %213 : vector<8x32xf32>
    %215 = arith.mulf %210, %214 : vector<8x32xf32>
    %216 = vector.extract_strided_slice %175 {offsets = [16, 0], sizes = [8, 128], strides = [1, 1]} : vector<64x128xf32> to vector<8x128xf32>
    %cst_48 = arith.constant dense<0.000000e+00> : vector<8x128xf32>
    %217 = tpu.matmul %215, %171, %cst_48 {dimension_numbers = #tpu.dot_dimension_numbers<[1], [0], [0], [1], [0, 0, 1, 1], [], []>} : vector<8x32xf32>, vector<32x128xf32>, vector<8x128xf32> -> vector<8x128xf32>
    %218 = arith.addf %216, %217 : vector<8x128xf32>
    %219 = vector.extract_strided_slice %218 {offsets = [0, 0], sizes = [8, 96], strides = [1, 1]} : vector<8x128xf32> to vector<8x96xf32>
    %220 = arith.negf %219 : vector<8x96xf32>
    %221 = math.exp %220 : vector<8x96xf32>
    %cst_49 = arith.constant 1.000000e+00 : f32
    %222 = vector.broadcast %cst_49 : f32 to vector<8x96xf32>
    %223 = arith.addf %222, %221 : vector<8x96xf32>
    %224 = arith.divf %222, %223 : vector<8x96xf32>
    %225 = vector.extract_strided_slice %218 {offsets = [0, 96], sizes = [8, 32], strides = [1, 1]} : vector<8x128xf32> to vector<8x32xf32>
    %226 = math.tanh %225 : vector<8x32xf32>
    %227 = vector.extract_strided_slice %224 {offsets = [0, 0], sizes = [8, 32], strides = [1, 1]} : vector<8x96xf32> to vector<8x32xf32>
    %228 = vector.extract_strided_slice %224 {offsets = [0, 32], sizes = [8, 32], strides = [1, 1]} : vector<8x96xf32> to vector<8x32xf32>
    %229 = vector.extract_strided_slice %224 {offsets = [0, 64], sizes = [8, 32], strides = [1, 1]} : vector<8x96xf32> to vector<8x32xf32>
    %230 = arith.mulf %228, %213 : vector<8x32xf32>
    %231 = arith.mulf %227, %226 : vector<8x32xf32>
    %232 = arith.addf %230, %231 : vector<8x32xf32>
    %233 = math.tanh %232 : vector<8x32xf32>
    %234 = arith.mulf %229, %233 : vector<8x32xf32>
    %235 = vector.extract_strided_slice %175 {offsets = [24, 0], sizes = [8, 128], strides = [1, 1]} : vector<64x128xf32> to vector<8x128xf32>
    %cst_50 = arith.constant dense<0.000000e+00> : vector<8x128xf32>
    %236 = tpu.matmul %234, %171, %cst_50 {dimension_numbers = #tpu.dot_dimension_numbers<[1], [0], [0], [1], [0, 0, 1, 1], [], []>} : vector<8x32xf32>, vector<32x128xf32>, vector<8x128xf32> -> vector<8x128xf32>
    %237 = arith.addf %235, %236 : vector<8x128xf32>
    %238 = vector.extract_strided_slice %237 {offsets = [0, 0], sizes = [8, 96], strides = [1, 1]} : vector<8x128xf32> to vector<8x96xf32>
    %239 = arith.negf %238 : vector<8x96xf32>
    %240 = math.exp %239 : vector<8x96xf32>
    %cst_51 = arith.constant 1.000000e+00 : f32
    %241 = vector.broadcast %cst_51 : f32 to vector<8x96xf32>
    %242 = arith.addf %241, %240 : vector<8x96xf32>
    %243 = arith.divf %241, %242 : vector<8x96xf32>
    %244 = vector.extract_strided_slice %237 {offsets = [0, 96], sizes = [8, 32], strides = [1, 1]} : vector<8x128xf32> to vector<8x32xf32>
    %245 = math.tanh %244 : vector<8x32xf32>
    %246 = vector.extract_strided_slice %243 {offsets = [0, 0], sizes = [8, 32], strides = [1, 1]} : vector<8x96xf32> to vector<8x32xf32>
    %247 = vector.extract_strided_slice %243 {offsets = [0, 32], sizes = [8, 32], strides = [1, 1]} : vector<8x96xf32> to vector<8x32xf32>
    %248 = vector.extract_strided_slice %243 {offsets = [0, 64], sizes = [8, 32], strides = [1, 1]} : vector<8x96xf32> to vector<8x32xf32>
    %249 = arith.mulf %247, %232 : vector<8x32xf32>
    %250 = arith.mulf %246, %245 : vector<8x32xf32>
    %251 = arith.addf %249, %250 : vector<8x32xf32>
    %252 = math.tanh %251 : vector<8x32xf32>
    %253 = arith.mulf %248, %252 : vector<8x32xf32>
    %254 = vector.extract_strided_slice %175 {offsets = [32, 0], sizes = [8, 128], strides = [1, 1]} : vector<64x128xf32> to vector<8x128xf32>
    %cst_52 = arith.constant dense<0.000000e+00> : vector<8x128xf32>
    %255 = tpu.matmul %253, %171, %cst_52 {dimension_numbers = #tpu.dot_dimension_numbers<[1], [0], [0], [1], [0, 0, 1, 1], [], []>} : vector<8x32xf32>, vector<32x128xf32>, vector<8x128xf32> -> vector<8x128xf32>
    %256 = arith.addf %254, %255 : vector<8x128xf32>
    %257 = vector.extract_strided_slice %256 {offsets = [0, 0], sizes = [8, 96], strides = [1, 1]} : vector<8x128xf32> to vector<8x96xf32>
    %258 = arith.negf %257 : vector<8x96xf32>
    %259 = math.exp %258 : vector<8x96xf32>
    %cst_53 = arith.constant 1.000000e+00 : f32
    %260 = vector.broadcast %cst_53 : f32 to vector<8x96xf32>
    %261 = arith.addf %260, %259 : vector<8x96xf32>
    %262 = arith.divf %260, %261 : vector<8x96xf32>
    %263 = vector.extract_strided_slice %256 {offsets = [0, 96], sizes = [8, 32], strides = [1, 1]} : vector<8x128xf32> to vector<8x32xf32>
    %264 = math.tanh %263 : vector<8x32xf32>
    %265 = vector.extract_strided_slice %262 {offsets = [0, 0], sizes = [8, 32], strides = [1, 1]} : vector<8x96xf32> to vector<8x32xf32>
    %266 = vector.extract_strided_slice %262 {offsets = [0, 32], sizes = [8, 32], strides = [1, 1]} : vector<8x96xf32> to vector<8x32xf32>
    %267 = vector.extract_strided_slice %262 {offsets = [0, 64], sizes = [8, 32], strides = [1, 1]} : vector<8x96xf32> to vector<8x32xf32>
    %268 = arith.mulf %266, %251 : vector<8x32xf32>
    %269 = arith.mulf %265, %264 : vector<8x32xf32>
    %270 = arith.addf %268, %269 : vector<8x32xf32>
    %271 = math.tanh %270 : vector<8x32xf32>
    %272 = arith.mulf %267, %271 : vector<8x32xf32>
    %273 = vector.extract_strided_slice %175 {offsets = [40, 0], sizes = [8, 128], strides = [1, 1]} : vector<64x128xf32> to vector<8x128xf32>
    %cst_54 = arith.constant dense<0.000000e+00> : vector<8x128xf32>
    %274 = tpu.matmul %272, %171, %cst_54 {dimension_numbers = #tpu.dot_dimension_numbers<[1], [0], [0], [1], [0, 0, 1, 1], [], []>} : vector<8x32xf32>, vector<32x128xf32>, vector<8x128xf32> -> vector<8x128xf32>
    %275 = arith.addf %273, %274 : vector<8x128xf32>
    %276 = vector.extract_strided_slice %275 {offsets = [0, 0], sizes = [8, 96], strides = [1, 1]} : vector<8x128xf32> to vector<8x96xf32>
    %277 = arith.negf %276 : vector<8x96xf32>
    %278 = math.exp %277 : vector<8x96xf32>
    %cst_55 = arith.constant 1.000000e+00 : f32
    %279 = vector.broadcast %cst_55 : f32 to vector<8x96xf32>
    %280 = arith.addf %279, %278 : vector<8x96xf32>
    %281 = arith.divf %279, %280 : vector<8x96xf32>
    %282 = vector.extract_strided_slice %275 {offsets = [0, 96], sizes = [8, 32], strides = [1, 1]} : vector<8x128xf32> to vector<8x32xf32>
    %283 = math.tanh %282 : vector<8x32xf32>
    %284 = vector.extract_strided_slice %281 {offsets = [0, 0], sizes = [8, 32], strides = [1, 1]} : vector<8x96xf32> to vector<8x32xf32>
    %285 = vector.extract_strided_slice %281 {offsets = [0, 32], sizes = [8, 32], strides = [1, 1]} : vector<8x96xf32> to vector<8x32xf32>
    %286 = vector.extract_strided_slice %281 {offsets = [0, 64], sizes = [8, 32], strides = [1, 1]} : vector<8x96xf32> to vector<8x32xf32>
    %287 = arith.mulf %285, %270 : vector<8x32xf32>
    %288 = arith.mulf %284, %283 : vector<8x32xf32>
    %289 = arith.addf %287, %288 : vector<8x32xf32>
    %290 = math.tanh %289 : vector<8x32xf32>
    %291 = arith.mulf %286, %290 : vector<8x32xf32>
    %292 = vector.extract_strided_slice %175 {offsets = [48, 0], sizes = [8, 128], strides = [1, 1]} : vector<64x128xf32> to vector<8x128xf32>
    %cst_56 = arith.constant dense<0.000000e+00> : vector<8x128xf32>
    %293 = tpu.matmul %291, %171, %cst_56 {dimension_numbers = #tpu.dot_dimension_numbers<[1], [0], [0], [1], [0, 0, 1, 1], [], []>} : vector<8x32xf32>, vector<32x128xf32>, vector<8x128xf32> -> vector<8x128xf32>
    %294 = arith.addf %292, %293 : vector<8x128xf32>
    %295 = vector.extract_strided_slice %294 {offsets = [0, 0], sizes = [8, 96], strides = [1, 1]} : vector<8x128xf32> to vector<8x96xf32>
    %296 = arith.negf %295 : vector<8x96xf32>
    %297 = math.exp %296 : vector<8x96xf32>
    %cst_57 = arith.constant 1.000000e+00 : f32
    %298 = vector.broadcast %cst_57 : f32 to vector<8x96xf32>
    %299 = arith.addf %298, %297 : vector<8x96xf32>
    %300 = arith.divf %298, %299 : vector<8x96xf32>
    %301 = vector.extract_strided_slice %294 {offsets = [0, 96], sizes = [8, 32], strides = [1, 1]} : vector<8x128xf32> to vector<8x32xf32>
    %302 = math.tanh %301 : vector<8x32xf32>
    %303 = vector.extract_strided_slice %300 {offsets = [0, 0], sizes = [8, 32], strides = [1, 1]} : vector<8x96xf32> to vector<8x32xf32>
    %304 = vector.extract_strided_slice %300 {offsets = [0, 32], sizes = [8, 32], strides = [1, 1]} : vector<8x96xf32> to vector<8x32xf32>
    %305 = vector.extract_strided_slice %300 {offsets = [0, 64], sizes = [8, 32], strides = [1, 1]} : vector<8x96xf32> to vector<8x32xf32>
    %306 = arith.mulf %304, %289 : vector<8x32xf32>
    %307 = arith.mulf %303, %302 : vector<8x32xf32>
    %308 = arith.addf %306, %307 : vector<8x32xf32>
    %309 = math.tanh %308 : vector<8x32xf32>
    %310 = arith.mulf %305, %309 : vector<8x32xf32>
    %311 = vector.extract_strided_slice %175 {offsets = [56, 0], sizes = [8, 128], strides = [1, 1]} : vector<64x128xf32> to vector<8x128xf32>
    %cst_58 = arith.constant dense<0.000000e+00> : vector<8x128xf32>
    %312 = tpu.matmul %310, %171, %cst_58 {dimension_numbers = #tpu.dot_dimension_numbers<[1], [0], [0], [1], [0, 0, 1, 1], [], []>} : vector<8x32xf32>, vector<32x128xf32>, vector<8x128xf32> -> vector<8x128xf32>
    %313 = arith.addf %311, %312 : vector<8x128xf32>
    %314 = vector.extract_strided_slice %313 {offsets = [0, 0], sizes = [8, 96], strides = [1, 1]} : vector<8x128xf32> to vector<8x96xf32>
    %315 = arith.negf %314 : vector<8x96xf32>
    %316 = math.exp %315 : vector<8x96xf32>
    %cst_59 = arith.constant 1.000000e+00 : f32
    %317 = vector.broadcast %cst_59 : f32 to vector<8x96xf32>
    %318 = arith.addf %317, %316 : vector<8x96xf32>
    %319 = arith.divf %317, %318 : vector<8x96xf32>
    %320 = vector.extract_strided_slice %313 {offsets = [0, 96], sizes = [8, 32], strides = [1, 1]} : vector<8x128xf32> to vector<8x32xf32>
    %321 = math.tanh %320 : vector<8x32xf32>
    %322 = vector.extract_strided_slice %319 {offsets = [0, 0], sizes = [8, 32], strides = [1, 1]} : vector<8x96xf32> to vector<8x32xf32>
    %323 = vector.extract_strided_slice %319 {offsets = [0, 32], sizes = [8, 32], strides = [1, 1]} : vector<8x96xf32> to vector<8x32xf32>
    %324 = vector.extract_strided_slice %319 {offsets = [0, 64], sizes = [8, 32], strides = [1, 1]} : vector<8x96xf32> to vector<8x32xf32>
    %325 = arith.mulf %323, %308 : vector<8x32xf32>
    %326 = arith.mulf %322, %321 : vector<8x32xf32>
    %327 = arith.addf %325, %326 : vector<8x32xf32>
    %328 = math.tanh %327 : vector<8x32xf32>
    %329 = arith.mulf %324, %328 : vector<8x32xf32>
    %c0_60 = arith.constant 0 : index
    %c0_61 = arith.constant 0 : index
    %330 = vector.load %arg3[%c0_60, %c0_61] : memref<33x4xf32, #tpu.memory_space<vmem>>, vector<32x4xf32>
    %c32_62 = arith.constant 32 : index
    %c0_63 = arith.constant 0 : index
    %331 = vector.load %arg3[%c32_62, %c0_63] : memref<33x4xf32, #tpu.memory_space<vmem>>, vector<1x4xf32>
    %cst_64 = arith.constant dense<0.000000e+00> : vector<8x4xf32>
    %332 = tpu.matmul %329, %330, %cst_64 {dimension_numbers = #tpu.dot_dimension_numbers<[1], [0], [0], [1], [0, 0, 1, 1], [], []>} : vector<8x32xf32>, vector<32x4xf32>, vector<8x4xf32> -> vector<8x4xf32>
    %333 = vector.broadcast %331 : vector<1x4xf32> to vector<8x4xf32>
    %334 = arith.addf %332, %333 : vector<8x4xf32>
    %c0_65 = arith.constant 0 : index
    %c0_66 = arith.constant 0 : index
    %335 = vector.load %arg4[%c0_65, %c0_66] : memref<8x4xf32, #tpu.memory_space<vmem>>, vector<8x4xf32>
    tpu.vector_store %arg4[%c0_65, %c0_66], %334 {strides = array<i32>} : memref<8x4xf32, #tpu.memory_space<vmem>>, vector<8x4xf32>,
    return
  }
}

</mosaic_0001>

<bundles_post_ra>
// kernel: eeg_lstm_fc_forward.1
= control target key start
LH: loop header
LB: loop body
LE: loop exit
PB: predicated region body
PF: predicated region fallthrough
CT: control target
= control target key end

     0   :  { %vm35_vm0 = vcmask 64512   ;;  %v2527_v0 = vmov 0.0   ;;  %vm2528_vm1 = vmmov 0   ;;  %s2529_s5 = smov 32   ;;  %vm165_vm2 = vcmask 261120   ;;  %s2981_s1 = inlined_call_operand.vmem [shape: f32[41,128], index: 1, kind: input, shape index: {}]   ;;  %s2982_s0 = inlined_call_operand.vmem [shape: f32[64,8], index: 0, kind: input, shape index: {}]   ;;  %s2983_s2 = inlined_call_operand.vmem [shape: f32[65,128], index: 2, kind: input, shape index: {}]   ;;  %s2984_s3 = inlined_call_operand.vmem [shape: f32[33,4], index: 3, kind: input, shape index: {}]   ;;  %s2985_s4 = inlined_call_operand.vmem [shape: f32[8,4], index: 4, kind: output, shape index: {}]  }
   0x1   :  { %2188 = vmatprep.subr.mxu1 %v2527_v0  ;;  %v25_v1 = vld [vmem:[%s2981_s1] sm:$0xff]  ;;  %2196 = vmatprep.mubr.msk.f32.mxu1 %vm2528_vm1, %v2527_v0  ;;  %v18_v4 = vld [vmem:[%s2982_s0 + $0x8] sm:$0xff]  ;;  %v2577_v5 = vld [vmem:[%s2981_s1 + $0x18] sm:$0xff]  ;;  %vm2012_vm3 = vcmask 31744  }
   0x2   :  { %v2563_v2 = vld [vmem:[%s2981_s1 + $0x20] sm:$0xff]  ;;  %2174 = vmatprep.subr.mxu0 %v25_v1  ;;  %v2585_v6 = vld [vmem:[%s2981_s1 + $0x10] sm:$0xff]  ;;  %v2593_v7 = vld [vmem:[%s2981_s1 + $0x8] sm:$0xff] }
   0x3   :  { %v17_v3 = vld [vmem:[%s2982_s0] sm:$0xff]  ;;  %2189 = vmatpush3.msra.mxu1 %v2563_v2  ;;  %2175 = vmatpush3.msra.mxu0 %v25_v1  ;;  %v2621_v9 = vld [vmem:[%s2981_s1 + $0x28] ss:$0 sm:$0xff]  ;;  %s2530_s1 = smov 64   ;;  %v19_v43 = vld [vmem:[%s2982_s0 + $0x10] sm:$0xff] }
   0x4   :  { %2176 = vmatprep.mubr.msk.f32.mxu0 %vm35_vm0, %v17_v3  ;;  %2190 = vmatprep.subr.mxu1 %v2527_v0  ;;  %v20_v44 = vld [vmem:[%s2982_s0 + $0x18] sm:$0xff]  ;;  %v21_v45 = vld [vmem:[%s2982_s0 + $0x20] sm:$0xff]  ;;  %v22_v46 = vld [vmem:[%s2982_s0 + $0x28] sm:$0xff] }
   0x5   :  { %2177 = vmatmul.mubr.msk.f32.vlgmr.msra.gmra.mxu0 %vm35_vm0, %v18_v4  ;;  %2191 = vmatpush3.msra.mxu1 %v2577_v5  ;;  %v23_v47 = vld [vmem:[%s2982_s0 + $0x30] sm:$0xff]  ;;  %v24_v48 = vld [vmem:[%s2982_s0 + $0x38] sm:$0xff] }
   0x6   :  { %2210 = vmatprep.subr.mxu0 %v2527_v0  ;;  %2192 = vmatprep.subr.mxu1 %v2527_v0 }
   0x7   :  { %2211 = vmatpush3.msra.mxu0 %v2563_v2  ;;  %2193 = vmatpush3.msra.mxu1 %v2585_v6 }
   0x8   :  { %2212 = vmatprep.subr.mxu0 %v2527_v0  ;;  %2194 = vmatprep.subr.mxu1 %v2527_v0 }
   0x9   :  { %2213 = vmatpush3.msra.mxu0 %v2577_v5  ;;  %2195 = vmatpush3.msra.mxu1 %v2593_v7 }
   0xa   :  { %2214 = vmatprep.subr.mxu0 %v2527_v0  ;;  %2197 = vmatmul.mubr.f32.vlgmr.msra.gmra.mxu1 %v2527_v0 }
   0xb   :  { %2199 = vmatprep.subr.mxu1 %v2527_v0  ;;  %2207 = vmatprep.mubr.msk.f32.mxu1 %vm2528_vm1, %v2527_v0 }
   0xc   :  { %2200 = vmatpush3.msra.mxu1 %v2563_v2  ;;  %2215 = vmatpush3.msra.mxu0 %v2585_v6 }
   0xd   :  { %2201 = vmatprep.subr.mxu1 %v2527_v0  ;;  %2216 = vmatprep.subr.mxu0 %v2527_v0 }
   0xe   :  { %2202 = vmatpush3.msra.mxu1 %v2577_v5  ;;  %2217 = vmatpush3.msra.mxu0 %v2593_v7 }
   0xf   :  { %2203 = vmatprep.subr.mxu1 %v2527_v0  ;;  %2232 = vmatprep.subr.mxu0 %v2527_v0 }
  0x10   :  { %2204 = vmatpush3.msra.mxu1 %v2585_v6  ;;  %2179 = vmatprep.mubr.msk.f32.mxu0 %vm35_vm0, %v19_v43 }
  0x11   :  { %2205 = vmatprep.subr.mxu1 %v2527_v0  ;;  %2180 = vmatmul.mubr.msk.f32.gmra.mxu0 %vm35_vm0, %v20_v44 }
  0x12   :  { %2206 = vmatpush3.msra.mxu1 %v2593_v7  ;;  %2182 = vmatprep.mubr.msk.f32.mxu0 %vm35_vm0, %v21_v45 }
  0x13   :  { %2221 = vmatprep.subr.mxu1 %v2527_v0 }
  0x15   :  { %2183 = vmatmul.mubr.msk.f32.gmra.mxu0 %vm35_vm0, %v22_v46 }
  0x16   :  { %2185 = vmatprep.mubr.msk.f32.mxu0 %vm35_vm0, %v23_v47 }
  0x19   :  { %2186 = vmatmul.mubr.msk.f32.gmra.mxu0 %vm35_vm0, %v24_v48 }
  0x1a   :  { %2218 = vmatprep.mubr.msk.f32.mxu0 %vm2528_vm1, %v2527_v0 }
  0xc5   :  { %v2178_v8 = vpop.f32.mrf.mxu0 }
  0xc6   :  { %v132_v29 = vadd.f32 %v2178_v8, %v2621_v9 }
  0xc7   :  { %v126_v10 = vpop.f32.mrf.mxu0 }
  0xc8   :  { %v127_v11 = vadd.f32 %v2621_v9, %v126_v10 }
  0xca   :  { %v235_v12 = vpop.f32.mrf.mxu1 }
  0xcb   :  { %v239_v13 = vadd.f32 %v235_v12, %v127_v11 }
  0xcc   :  { %v2198_v14 = vpop.f32.mrf.mxu1 }
  0xcd   :  { %2399 = vtanh.f32 %v239_v13  ;;  %v2027_v16 = vmul.f32 -1.442695, %v239_v13 }
  0xcf   :  { %2401 = vpow2.f32 %v2027_v16 }
  0xd1   :  { %v2181_v53 = vpop.f32.mrf.mxu0 }
  0xd3   :  { %v136_v54 = vpop.f32.mrf.mxu0 }
  0xd4   :  { %v137_v59 = vadd.f32 %v2621_v9, %v136_v54 }
  0xd5   :  { %v2683_v55 = vpop.f32.mrf.mxu0 }
  0xd7   :  { %v2685_v56 = vpop.f32.mrf.mxu0 }
  0xd9   :  { %v2687_v57 = vpop.f32.mrf.mxu0 }
  0xda   :  { %v2400_v15 = vpop.eup %2399 }
  0xdb   :  { %249 = vrot.lane.b32.xlu0 %v2400_v15, %s2529_s5  ;;  %v2689_v58 = vpop.f32.mrf.mxu0 }
  0xdc   :  { %v2402_v17 = vpop.eup %2401 }
  0xdd   :  { %v243_v18 = vadd.f32 1.0, %v2402_v17 }
  0xdf   :  { %2403 = vrcp.f32 %v243_v18 }
  0xec   :  { %v2404_v19 = vpop.eup %2403 }
  0xed   :  { %v247_v22 = vmul.f32 0.0, %v2404_v19 }
 0x14d   :  { %v250_v20 = vpop.permute.xlu0 %249 }
 0x14e   :  { %v252_v21 = vmul.f32 %v2404_v19, %v250_v20 }
 0x150   :  { %254 = vrot.lane.b32.xlu0 %v252_v21, %s2529_s5 }
 0x1c2   :  { %v255_v23 = vpop.permute.xlu0 %254 }
 0x1c3   :  { %v257_v24 = vadd.f32 %v255_v23, %v247_v22 }
 0x1c5   :  { %2405 = vtanh.f32 %v257_v24 }
 0x1d2   :  { %v2406_v25 = vpop.eup %2405 }
 0x1d3   :  { %260 = vrot.lane.b32.xlu1 %v2406_v25, %s2529_s5 }
 0x245   :  { %v261_v26 = vpop.permute.xlu1 %260 }
 0x246   :  { %v263_v27 = vmul.f32 %v2404_v19, %v261_v26  ;;  %v142_v19 = vadd.f32 %v2181_v53, %v2621_v9 }
 0x248   :  { %265 = vrot.lane.b32.xlu1 %v263_v27, %s2530_s1 }
 0x2ba   :  { %v266_v28 = vpop.permute.xlu1 %265 }
 0x2bb   :  { %268 = vst.msk [vmem:[#allocation2] sm:$0xff] %vm165_vm2, %v266_v28  ;;  %2208 = vmatmul.mubr.msk.f32.vlgmr.msra.gmra.mxu1 %vm165_vm2, %v266_v28 }
 0x2bc   :  { %2222 = vmatpush3.msra.mxu1 %v2563_v2  ;;  %2229 = vmatprep.mubr.msk.f32.mxu1 %vm2528_vm1, %v2527_v0 }
 0x2bd   :  { %2223 = vmatprep.subr.mxu1 %v2527_v0 }
 0x2be   :  { %2224 = vmatpush3.msra.mxu1 %v2577_v5 }
 0x2bf   :  { %2225 = vmatprep.subr.mxu1 %v2527_v0 }
 0x2c0   :  { %2226 = vmatpush3.msra.mxu1 %v2585_v6 }
 0x2c1   :  { %2227 = vmatprep.subr.mxu1 %v2527_v0 }
 0x2c2   :  { %2228 = vmatpush3.msra.mxu1 %v2593_v7 }
 0x2c3   :  { %2243 = vmatprep.subr.mxu1 %v2527_v0 }
 0x37b   :  { %v337_v30 = vpop.f32.mrf.mxu1 }
 0x37c   :  { %v341_v31 = vadd.f32 %v337_v30, %v132_v29 }
 0x37d   :  { %v2209_v32 = vpop.f32.mrf.mxu1 }
 0x37e   :  { %2407 = vtanh.f32 %v341_v31  ;;  %v2029_v34 = vmul.f32 -1.442695, %v341_v31 }
 0x380   :  { %2409 = vpow2.f32 %v2029_v34 }
 0x38b   :  { %v2408_v33 = vpop.eup %2407 }
 0x38c   :  { %351 = vrot.lane.b32.xlu0 %v2408_v33, %s2529_s5 }
 0x38d   :  { %v2410_v35 = vpop.eup %2409 }
 0x38e   :  { %v345_v36 = vadd.f32 1.0, %v2410_v35 }
 0x390   :  { %2411 = vrcp.f32 %v345_v36 }
 0x39d   :  { %v2412_v37 = vpop.eup %2411 }
 0x39e   :  { %v349_v40 = vmul.f32 %v2412_v37, %v257_v24 }
 0x3fe   :  { %v352_v38 = vpop.permute.xlu0 %351 }
 0x3ff   :  { %v354_v39 = vmul.f32 %v2412_v37, %v352_v38 }
 0x401   :  { %356 = vrot.lane.b32.xlu1 %v354_v39, %s2529_s5 }
 0x473   :  { %v357_v41 = vpop.permute.xlu1 %356 }
 0x474   :  { %v359_v42 = vadd.f32 %v357_v41, %v349_v40 }
 0x476   :  { %2413 = vtanh.f32 %v359_v42 }
 0x483   :  { %v2414_v49 = vpop.eup %2413 }
 0x484   :  { %362 = vrot.lane.b32.xlu0 %v2414_v49, %s2529_s5 }
 0x4f6   :  { %v363_v50 = vpop.permute.xlu0 %362 }
 0x4f7   :  { %v365_v51 = vmul.f32 %v2412_v37, %v363_v50  ;;  %v147_v37 = vadd.f32 %v2621_v9, %v2685_v56 }
 0x4f9   :  { %367 = vrot.lane.b32.xlu1 %v365_v51, %s2530_s1 }
 0x56b   :  { %v368_v52 = vpop.permute.xlu1 %367 }
 0x56c   :  { %370 = vst.msk [vmem:[#allocation2 + $0x8] sm:$0xff] %vm165_vm2, %v368_v52  ;;  %2219 = vmatmul.mubr.msk.f32.vlgmr.msra.gmra.mxu0 %vm165_vm2, %v368_v52 }
 0x56d   :  { %2233 = vmatpush3.msra.mxu0 %v2563_v2  ;;  %2240 = vmatprep.mubr.msk.f32.mxu0 %vm2528_vm1, %v2527_v0 }
 0x56e   :  { %2234 = vmatprep.subr.mxu0 %v2527_v0 }
 0x56f   :  { %2235 = vmatpush3.msra.mxu0 %v2577_v5 }
 0x570   :  { %2236 = vmatprep.subr.mxu0 %v2527_v0 }
 0x571   :  { %2237 = vmatpush3.msra.mxu0 %v2585_v6 }
 0x572   :  { %2238 = vmatprep.subr.mxu0 %v2527_v0 }
 0x573   :  { %2239 = vmatpush3.msra.mxu0 %v2593_v7 }
 0x574   :  { %2254 = vmatprep.subr.mxu0 %v2527_v0 }
 0x62c   :  { %v439_v60 = vpop.f32.mrf.mxu0 }
 0x62d   :  { %v443_v61 = vadd.f32 %v439_v60, %v137_v59 }
 0x62e   :  { %v2220_v62 = vpop.f32.mrf.mxu0 }
 0x62f   :  { %2415 = vtanh.f32 %v443_v61  ;;  %v2031_v1 = vmul.f32 -1.442695, %v443_v61 }
 0x631   :  { %2417 = vpow2.f32 %v2031_v1 }
 0x63c   :  { %v2416_v63 = vpop.eup %2415 }
 0x63d   :  { %453 = vrot.lane.b32.xlu0 %v2416_v63, %s2529_s5 }
 0x63e   :  { %v2418_v3 = vpop.eup %2417 }
 0x63f   :  { %v447_v4 = vadd.f32 1.0, %v2418_v3 }
 0x641   :  { %2419 = vrcp.f32 %v447_v4 }
 0x64e   :  { %v2420_v8 = vpop.eup %2419 }
 0x64f   :  { %v451_v12 = vmul.f32 %v2420_v8, %v359_v42 }
 0x6af   :  { %v454_v10 = vpop.permute.xlu0 %453 }
 0x6b0   :  { %v456_v11 = vmul.f32 %v2420_v8, %v454_v10 }
 0x6b2   :  { %458 = vrot.lane.b32.xlu1 %v456_v11, %s2529_s5 }
 0x724   :  { %v459_v13 = vpop.permute.xlu1 %458 }
 0x725   :  { %v461_v14 = vadd.f32 %v459_v13, %v451_v12 }
 0x727   :  { %2421 = vtanh.f32 %v461_v14 }
 0x734   :  { %v2422_v15 = vpop.eup %2421 }
 0x735   :  { %464 = vrot.lane.b32.xlu0 %v2422_v15, %s2529_s5  ;;  %v983_v15 = vld [vmem:[#allocation2] sm:$0xff] }
 0x7a7   :  { %v465_v16 = vpop.permute.xlu0 %464 }
 0x7a8   :  { %v467_v17 = vmul.f32 %v2420_v8, %v465_v16  ;;  %v994_v8 = vld [vmem:[%s2983_s2 + $0x18] sm:$0xff]  ;;  %v992_v16 = vld [vmem:[%s2983_s2 + $0x8] sm:$0xff] }
 0x7aa   :  { %469 = vrot.lane.b32.xlu1 %v467_v17, %s2530_s1  ;;  %v991_v17 = vld [vmem:[%s2983_s2] sm:$0xff] }
 0x81c   :  { %v470_v18 = vpop.permute.xlu1 %469 }
 0x81d   :  { %472 = vst.msk [vmem:[#allocation2 + $0x10] sm:$0xff] %vm165_vm2, %v470_v18  ;;  %2230 = vmatmul.mubr.msk.f32.vlgmr.msra.gmra.mxu1 %vm165_vm2, %v470_v18  ;;  %v984_v18 = vld [vmem:[#allocation2 + $0x8] sm:$0xff] }
 0x81e   :  { %2244 = vmatpush3.msra.mxu1 %v2563_v2  ;;  %2251 = vmatprep.mubr.msk.f32.mxu1 %vm2528_vm1, %v2527_v0 }
 0x81f   :  { %2245 = vmatprep.subr.mxu1 %v2527_v0 }
 0x820   :  { %2246 = vmatpush3.msra.mxu1 %v2577_v5 }
 0x821   :  { %2247 = vmatprep.subr.mxu1 %v2527_v0 }
 0x822   :  { %2248 = vmatpush3.msra.mxu1 %v2585_v6 }
 0x823   :  { %2249 = vmatprep.subr.mxu1 %v2527_v0 }
 0x824   :  { %2250 = vmatpush3.msra.mxu1 %v2593_v7 }
 0x825   :  { %2265 = vmatprep.subr.mxu1 %v2527_v0 }
 0x8dd   :  { %v541_v20 = vpop.f32.mrf.mxu1 }
 0x8de   :  { %v545_v21 = vadd.f32 %v541_v20, %v142_v19  ;;  %v985_v19 = vld [vmem:[#allocation2 + $0x10] sm:$0xff] }
 0x8df   :  { %v2231_v22 = vpop.f32.mrf.mxu1 }
 0x8e0   :  { %2423 = vtanh.f32 %v545_v21  ;;  %v2033_v24 = vmul.f32 -1.442695, %v545_v21 }
 0x8e2   :  { %2425 = vpow2.f32 %v2033_v24 }
 0x8ed   :  { %v2424_v23 = vpop.eup %2423 }
 0x8ee   :  { %555 = vrot.lane.b32.xlu0 %v2424_v23, %s2529_s5  ;;  %v157_v23 = vadd.f32 %v2621_v9, %v2689_v58 }
 0x8ef   :  { %v2426_v25 = vpop.eup %2425 }
 0x8f0   :  { %v549_v26 = vadd.f32 1.0, %v2426_v25 }
 0x8f2   :  { %2427 = vrcp.f32 %v549_v26 }
 0x8ff   :  { %v2428_v27 = vpop.eup %2427 }
 0x900   :  { %v553_v30 = vmul.f32 %v2428_v27, %v461_v14  ;;  %v993_v14 = vld [vmem:[%s2983_s2 + $0x10] sm:$0xff] }
 0x960   :  { %v556_v28 = vpop.permute.xlu0 %555 }
 0x961   :  { %v558_v29 = vmul.f32 %v2428_v27, %v556_v28 }
 0x963   :  { %560 = vrot.lane.b32.xlu1 %v558_v29, %s2529_s5 }
 0x9d5   :  { %v561_v31 = vpop.permute.xlu1 %560 }
 0x9d6   :  { %v563_v32 = vadd.f32 %v561_v31, %v553_v30 }
 0x9d8   :  { %2429 = vtanh.f32 %v563_v32 }
 0x9e5   :  { %v2430_v33 = vpop.eup %2429 }
 0x9e6   :  { %566 = vrot.lane.b32.xlu0 %v2430_v33, %s2529_s5 }
 0xa58   :  { %v567_v34 = vpop.permute.xlu0 %566 }
 0xa59   :  { %v569_v35 = vmul.f32 %v2428_v27, %v567_v34 }
 0xa5b   :  { %571 = vrot.lane.b32.xlu1 %v569_v35, %s2530_s1 }
 0xacd   :  { %v572_v36 = vpop.permute.xlu1 %571 }
 0xace   :  { %574 = vst.msk [vmem:[#allocation2 + $0x18] sm:$0xff] %vm165_vm2, %v572_v36  ;;  %2241 = vmatmul.mubr.msk.f32.vlgmr.msra.gmra.mxu0 %vm165_vm2, %v572_v36 }
 0xacf   :  { %2255 = vmatpush3.msra.mxu0 %v2563_v2  ;;  %2262 = vmatprep.mubr.msk.f32.mxu0 %vm2528_vm1, %v2527_v0 }
 0xad0   :  { %2256 = vmatprep.subr.mxu0 %v2527_v0 }
 0xad1   :  { %2257 = vmatpush3.msra.mxu0 %v2577_v5 }
 0xad2   :  { %2258 = vmatprep.subr.mxu0 %v2527_v0 }
 0xad3   :  { %2259 = vmatpush3.msra.mxu0 %v2585_v6 }
 0xad4   :  { %2260 = vmatprep.subr.mxu0 %v2527_v0 }
 0xad5   :  { %2261 = vmatpush3.msra.mxu0 %v2593_v7  ;;  %v986_v20 = vld [vmem:[#allocation2 + $0x18] sm:$0xff] }
 0xad6   :  { %2276 = vmatprep.subr.mxu0 %v994_v8 }
 0xb8e   :  { %v643_v38 = vpop.f32.mrf.mxu0 }
 0xb8f   :  { %v647_v39 = vadd.f32 %v643_v38, %v147_v37  ;;  %v2780_v37 = vld [vmem:[%s2983_s2 + $0x38] sm:$0xff]  ;;  %v2786_v38 = vld [vmem:[%s2983_s2 + $0x30] sm:$0xff] }
 0xb90   :  { %v2242_v40 = vpop.f32.mrf.mxu0 }
 0xb91   :  { %2431 = vtanh.f32 %v647_v39  ;;  %v2035_v42 = vmul.f32 -1.442695, %v647_v39  ;;  %v2793_v39 = vld [vmem:[%s2983_s2 + $0x28] sm:$0xff]  ;;  %v2800_v40 = vld [vmem:[%s2983_s2 + $0x20] sm:$0xff] }
 0xb93   :  { %2433 = vpow2.f32 %v2035_v42 }
 0xb9e   :  { %v2432_v41 = vpop.eup %2431 }
 0xb9f   :  { %657 = vrot.lane.b32.xlu0 %v2432_v41, %s2529_s5 }
 0xba0   :  { %v2434_v43 = vpop.eup %2433 }
 0xba1   :  { %v651_v44 = vadd.f32 1.0, %v2434_v43 }
 0xba3   :  { %2435 = vrcp.f32 %v651_v44 }
 0xbb0   :  { %v2436_v45 = vpop.eup %2435 }
 0xbb1   :  { %v655_v48 = vmul.f32 %v2436_v45, %v563_v32 }
 0xc11   :  { %v658_v46 = vpop.permute.xlu0 %657 }
 0xc12   :  { %v660_v47 = vmul.f32 %v2436_v45, %v658_v46 }
 0xc14   :  { %662 = vrot.lane.b32.xlu1 %v660_v47, %s2529_s5 }
 0xc86   :  { %v663_v49 = vpop.permute.xlu1 %662 }
 0xc87   :  { %v665_v50 = vadd.f32 %v663_v49, %v655_v48 }
 0xc89   :  { %2437 = vtanh.f32 %v665_v50 }
 0xc96   :  { %v2438_v51 = vpop.eup %2437 }
 0xc97   :  { %668 = vrot.lane.b32.xlu0 %v2438_v51, %s2529_s5  ;;  %v2837_v51 = vld [vmem:[%s2983_s2 + $0x40] ss:$0 sm:$0xff] }
 0xd09   :  { %v669_v52 = vpop.permute.xlu0 %668 }
 0xd0a   :  { %v671_v53 = vmul.f32 %v2436_v45, %v669_v52  ;;  %v162_v45 = vadd.f32 %v2687_v57, %v2621_v9 }
 0xd0c   :  { %673 = vrot.lane.b32.xlu1 %v671_v53, %s2530_s1 }
 0xd7e   :  { %v674_v54 = vpop.permute.xlu1 %673 }
 0xd7f   :  { %676 = vst.msk [vmem:[#allocation2 + $0x20] sm:$0xff] %vm165_vm2, %v674_v54  ;;  %2252 = vmatmul.mubr.msk.f32.vlgmr.msra.gmra.mxu1 %vm165_vm2, %v674_v54 }
 0xd80   :  { %2266 = vmatpush3.msra.mxu1 %v2563_v2  ;;  %2273 = vmatprep.mubr.msk.f32.mxu1 %vm2528_vm1, %v2527_v0  ;;  %v152_v2 = vadd.f32 %v2683_v55, %v2621_v9 }
 0xd81   :  { %2267 = vmatprep.subr.mxu1 %v2527_v0 }
 0xd82   :  { %2268 = vmatpush3.msra.mxu1 %v2577_v5 }
 0xd83   :  { %2269 = vmatprep.subr.mxu1 %v2527_v0 }
 0xd84   :  { %2270 = vmatpush3.msra.mxu1 %v2585_v6 }
 0xd85   :  { %2271 = vmatprep.subr.mxu1 %v2527_v0 }
 0xd86   :  { %2272 = vmatpush3.msra.mxu1 %v2593_v7  ;;  %v987_v21 = vld [vmem:[#allocation2 + $0x20] sm:$0xff] }
 0xd87   :  { %2296 = vmatprep.subr.mxu1 %v2527_v0 }
 0xe3f   :  { %v745_v56 = vpop.f32.mrf.mxu1 }
 0xe40   :  { %v749_v59 = vadd.f32 %v745_v56, %v152_v2 }
 0xe41   :  { %v2253_v60 = vpop.f32.mrf.mxu1 }
 0xe42   :  { %2439 = vtanh.f32 %v749_v59  ;;  %v2037_v5 = vmul.f32 -1.442695, %v749_v59 }
 0xe44   :  { %2441 = vpow2.f32 %v2037_v5 }
 0xe4f   :  { %v2440_v61 = vpop.eup %2439 }
 0xe50   :  { %759 = vrot.lane.b32.xlu0 %v2440_v61, %s2529_s5 }
 0xe51   :  { %v2442_v62 = vpop.eup %2441 }
 0xe52   :  { %v753_v6 = vadd.f32 1.0, %v2442_v62 }
 0xe54   :  { %2443 = vrcp.f32 %v753_v6 }
 0xe61   :  { %v2444_v63 = vpop.eup %2443 }
 0xe62   :  { %v757_v3 = vmul.f32 %v2444_v63, %v665_v50 }
 0xec2   :  { %v760_v1 = vpop.permute.xlu0 %759 }
 0xec3   :  { %v762_v7 = vmul.f32 %v2444_v63, %v760_v1 }
 0xec5   :  { %764 = vrot.lane.b32.xlu1 %v762_v7, %s2529_s5 }
 0xf37   :  { %v765_v4 = vpop.permute.xlu1 %764 }
 0xf38   :  { %v767_v55 = vadd.f32 %v765_v4, %v757_v3 }
 0xf3a   :  { %2445 = vtanh.f32 %v767_v55 }
 0xf47   :  { %v2446_v10 = vpop.eup %2445 }
 0xf48   :  { %770 = vrot.lane.b32.xlu0 %v2446_v10, %s2529_s5 }
 0xfba   :  { %v771_v11 = vpop.permute.xlu0 %770 }
 0xfbb   :  { %v773_v12 = vmul.f32 %v2444_v63, %v771_v11 }
 0xfbd   :  { %775 = vrot.lane.b32.xlu1 %v773_v12, %s2530_s1 }
0x102f   :  { %v776_v13 = vpop.permute.xlu1 %775 }
0x1030   :  { %778 = vst.msk [vmem:[#allocation2 + $0x28] sm:$0xff] %vm165_vm2, %v776_v13  ;;  %2263 = vmatmul.mubr.msk.f32.vlgmr.msra.gmra.mxu0 %vm165_vm2, %v776_v13 }
0x1031   :  { %2277 = vmatpush3.msra.mxu0 %v994_v8  ;;  %2284 = vmatprep.mubr.msk.f32.mxu0 %vm165_vm2, %v983_v15 }
0x1032   :  { %2278 = vmatprep.subr.mxu0 %v993_v14 }
0x1033   :  { %2279 = vmatpush3.msra.mxu0 %v993_v14 }
0x1034   :  { %2280 = vmatprep.subr.mxu0 %v992_v16 }
0x1035   :  { %2281 = vmatpush3.msra.mxu0 %v992_v16 }
0x1036   :  { %2282 = vmatprep.subr.mxu0 %v991_v17 }
0x1037   :  { %2283 = vmatpush3.msra.mxu0 %v991_v17  ;;  %v988_v22 = vld [vmem:[#allocation2 + $0x28] sm:$0xff] }
0x1038   :  { %2285 = vmatmul.mubr.msk.f32.vlgmr.msra.gmra.mxu0 %vm165_vm2, %v984_v18  ;;  %2318 = vmatprep.subr.mxu0 %v2527_v0 }
0x1039   :  { %2287 = vmatprep.mubr.msk.f32.mxu0 %vm165_vm2, %v985_v19  ;;  %2319 = vmatpush3.msra.mxu0 %v2780_v37 }
0x103a   :  { %2320 = vmatprep.subr.mxu0 %v2527_v0 }
0x103b   :  { %2321 = vmatpush3.msra.mxu0 %v2786_v38 }
0x103c   :  { %2288 = vmatmul.mubr.msk.f32.gmra.mxu0 %vm165_vm2, %v986_v20  ;;  %2322 = vmatprep.subr.mxu0 %v2527_v0 }
0x103d   :  { %2290 = vmatprep.mubr.msk.f32.mxu0 %vm165_vm2, %v987_v21  ;;  %2323 = vmatpush3.msra.mxu0 %v2793_v39 }
0x103e   :  { %2324 = vmatprep.subr.mxu0 %v2527_v0 }
0x103f   :  { %2325 = vmatpush3.msra.mxu0 %v2800_v40 }
0x1040   :  { %2291 = vmatmul.mubr.msk.f32.gmra.mxu0 %vm165_vm2, %v988_v22  ;;  %2340 = vmatprep.subr.mxu0 %v2527_v0 }
0x10f0   :  { %v847_v24 = vpop.f32.mrf.mxu0 }
0x10f1   :  { %v851_v25 = vadd.f32 %v847_v24, %v157_v23 }
0x10f2   :  { %v2264_v26 = vpop.f32.mrf.mxu0 }
0x10f3   :  { %2447 = vtanh.f32 %v851_v25  ;;  %v2039_v28 = vmul.f32 -1.442695, %v851_v25 }
0x10f5   :  { %2449 = vpow2.f32 %v2039_v28 }
0x10f8   :  { %v2832_v46 = vpop.f32.mrf.mxu0 }
0x10f9   :  { %v1100_v21 = vadd.f32 %v2832_v46, %v2837_v51 }
0x10fa   :  { %v1094_v50 = vpop.f32.mrf.mxu0 }
0x10fb   :  { %v1095_v52 = vadd.f32 %v2837_v51, %v1094_v50 }
0x1100   :  { %v2448_v27 = vpop.eup %2447 }
0x1101   :  { %861 = vrot.lane.b32.xlu0 %v2448_v27, %s2529_s5 }
0x1102   :  { %v2450_v29 = vpop.eup %2449 }
0x1103   :  { %v855_v30 = vadd.f32 1.0, %v2450_v29 }
0x1105   :  { %2451 = vrcp.f32 %v855_v30 }
0x1112   :  { %v2452_v31 = vpop.eup %2451 }
0x1113   :  { %v859_v34 = vmul.f32 %v2452_v31, %v767_v55 }
0x1173   :  { %v862_v32 = vpop.permute.xlu0 %861 }
0x1174   :  { %v864_v33 = vmul.f32 %v2452_v31, %v862_v32 }
0x1176   :  { %866 = vrot.lane.b32.xlu1 %v864_v33, %s2529_s5 }
0x11e8   :  { %v867_v35 = vpop.permute.xlu1 %866 }
0x11e9   :  { %v2773_v58 = vadd.f32 %v867_v35, %v859_v34 }
0x11eb   :  { %2453 = vtanh.f32 %v2773_v58 }
0x11f8   :  { %v2454_v36 = vpop.eup %2453 }
0x11f9   :  { %872 = vrot.lane.b32.xlu0 %v2454_v36, %s2529_s5 }
0x126b   :  { %v873_v41 = vpop.permute.xlu0 %872 }
0x126c   :  { %v875_v42 = vmul.f32 %v2452_v31, %v873_v41 }
0x126e   :  { %877 = vrot.lane.b32.xlu1 %v875_v42, %s2530_s1 }
0x12e0   :  { %v878_v43 = vpop.permute.xlu1 %877 }
0x12e1   :  { %880 = vst.msk [vmem:[#allocation2 + $0x30] sm:$0xff] %vm165_vm2, %v878_v43  ;;  %2274 = vmatmul.mubr.msk.f32.vlgmr.msra.gmra.mxu1 %vm165_vm2, %v878_v43 }
0x12e2   :  { %2297 = vmatpush3.msra.mxu1 %v2780_v37  ;;  %2304 = vmatprep.mubr.msk.f32.mxu1 %vm2528_vm1, %v2527_v0 }
0x12e3   :  { %2298 = vmatprep.subr.mxu1 %v2527_v0 }
0x12e4   :  { %2299 = vmatpush3.msra.mxu1 %v2786_v38 }
0x12e5   :  { %2300 = vmatprep.subr.mxu1 %v2527_v0 }
0x12e6   :  { %2301 = vmatpush3.msra.mxu1 %v2793_v39 }
0x12e7   :  { %2302 = vmatprep.subr.mxu1 %v2527_v0 }
0x12e8   :  { %2303 = vmatpush3.msra.mxu1 %v2800_v40  ;;  %v989_v44 = vld [vmem:[#allocation2 + $0x30] sm:$0xff] }
0x12e9   :  { %2305 = vmatmul.mubr.f32.vlgmr.msra.gmra.mxu1 %v2527_v0  ;;  %2293 = vmatprep.mubr.msk.f32.mxu0 %vm165_vm2, %v989_v44  ;;  %v2289_v44 = vpop.f32.mrf.mxu0 }
0x12ea   :  { %2307 = vmatprep.subr.mxu1 %v2527_v0  ;;  %2315 = vmatprep.mubr.msk.f32.mxu1 %vm2528_vm1, %v2527_v0 }
0x12eb   :  { %2308 = vmatpush3.msra.mxu1 %v2780_v37 }
0x12ec   :  { %2309 = vmatprep.subr.mxu1 %v2527_v0 }
0x12ed   :  { %2310 = vmatpush3.msra.mxu1 %v2786_v38 }
0x12ee   :  { %2311 = vmatprep.subr.mxu1 %v2527_v0 }
0x12ef   :  { %2312 = vmatpush3.msra.mxu1 %v2793_v39 }
0x12f0   :  { %2313 = vmatprep.subr.mxu1 %v2527_v0 }
0x12f1   :  { %2314 = vmatpush3.msra.mxu1 %v2800_v40 }
0x12f2   :  { %2329 = vmatprep.subr.mxu1 %v2527_v0 }
0x13a1   :  { %v949_v47 = vpop.f32.mrf.mxu1 }
0x13a2   :  { %v953_v48 = vadd.f32 %v949_v47, %v162_v45  ;;  %v1104_v45 = vpop.f32.mrf.mxu0 }
0x13a3   :  { %v2275_v49 = vpop.f32.mrf.mxu1  ;;  %v1105_v50 = vadd.f32 %v2837_v51, %v1104_v45 }
0x13a4   :  { %v2041_v3 = vmul.f32 -1.442695, %v953_v48  ;;  %v2881_v46 = vpop.f32.mrf.mxu0 }
0x13a6   :  { %v2883_v47 = vpop.f32.mrf.mxu0 }
0x13a9   :  { %v1199_v53 = vpop.f32.mrf.mxu1 }
0x13aa   :  { %v1203_v54 = vadd.f32 %v1199_v53, %v1095_v52 }
0x13ab   :  { %v2306_v2 = vpop.f32.mrf.mxu1 }
0x13ac   :  { %2455 = vtanh.f32 %v1203_v54  ;;  %v2051_v9 = vmul.f32 -1.442695, %v1203_v54 }
0x13ae   :  { %2457 = vpow2.f32 %v2051_v9 }
0x13b9   :  { %v2456_v56 = vpop.eup %2455 }
0x13ba   :  { %1213 = vrot.lane.b32.xlu0 %v2456_v56, %s2529_s5 }
0x13bb   :  { %v2458_v57 = vpop.eup %2457 }
0x13bc   :  { %v1207_v59 = vadd.f32 1.0, %v2458_v57 }
0x13be   :  { %2459 = vrcp.f32 %v1207_v59 }
0x13cb   :  { %v2460_v60 = vpop.eup %2459 }
0x13cc   :  { %v1211_v62 = vmul.f32 0.0, %v2460_v60 }
0x142c   :  { %v1214_v61 = vpop.permute.xlu0 %1213 }
0x142d   :  { %v1216_v5 = vmul.f32 %v2460_v60, %v1214_v61 }
0x142f   :  { %1218 = vrot.lane.b32.xlu1 %v1216_v5, %s2529_s5 }
0x14a1   :  { %v1219_v6 = vpop.permute.xlu1 %1218 }
0x14a2   :  { %v1221_v63 = vadd.f32 %v1219_v6, %v1211_v62 }
0x14a4   :  { %2461 = vtanh.f32 %v1221_v63 }
0x14a5   :  { %2463 = vtanh.f32 %v953_v48 }
0x14a6   :  { %2465 = vpow2.f32 %v2041_v3 }
0x14b1   :  { %v2462_v1 = vpop.eup %2461 }
0x14b2   :  { %1224 = vrot.lane.b32.xlu0 %v2462_v1, %s2529_s5  ;;  %v2464_v7 = vpop.eup %2463 }
0x14b3   :  { %v2466_v4 = vpop.eup %2465 }
0x14b4   :  { %v957_v55 = vadd.f32 1.0, %v2466_v4  ;;  %v1110_v4 = vadd.f32 %v2289_v44, %v2837_v51 }
0x14b6   :  { %963 = vrot.lane.b32.xlu0 %v2464_v7, %s2529_s5  ;;  %2467 = vrcp.f32 %v957_v55 }
0x14c3   :  { %v2468_v11 = vpop.eup %2467 }
0x14c4   :  { %v961_v15 = vmul.f32 %v2468_v11, %v2773_v58 }
0x1524   :  { %v1225_v8 = vpop.permute.xlu0 %1224 }
0x1525   :  { %v1227_v10 = vmul.f32 %v2460_v60, %v1225_v8 }
0x1527   :  { %1229 = vrot.lane.b32.xlu1 %v1227_v10, %s2530_s1 }
0x1528   :  { %v964_v12 = vpop.permute.xlu0 %963 }
0x1529   :  { %v966_v13 = vmul.f32 %v2468_v11, %v964_v12 }
0x152b   :  { %968 = vrot.lane.b32.xlu0 %v966_v13, %s2529_s5 }
0x1599   :  { %v1230_v14 = vpop.permute.xlu1 %1229 }
0x159a   :  { %2316 = vmatmul.mubr.msk.f32.vlgmr.msra.gmra.mxu1 %vm165_vm2, %v1230_v14 }
0x159b   :  { %2330 = vmatpush3.msra.mxu1 %v2780_v37  ;;  %2337 = vmatprep.mubr.msk.f32.mxu1 %vm2528_vm1, %v2527_v0 }
0x159c   :  { %2331 = vmatprep.subr.mxu1 %v2527_v0 }
0x159d   :  { %v969_v16 = vpop.permute.xlu0 %968  ;;  %2332 = vmatpush3.msra.mxu1 %v2786_v38 }
0x159e   :  { %v971_v17 = vadd.f32 %v969_v16, %v961_v15  ;;  %2333 = vmatprep.subr.mxu1 %v2527_v0 }
0x159f   :  { %2334 = vmatpush3.msra.mxu1 %v2793_v39 }
0x15a0   :  { %2469 = vtanh.f32 %v971_v17  ;;  %2335 = vmatprep.subr.mxu1 %v2527_v0 }
0x15a1   :  { %2336 = vmatpush3.msra.mxu1 %v2800_v40 }
0x15a2   :  { %2351 = vmatprep.subr.mxu1 %v2527_v0 }
0x15ad   :  { %v2470_v18 = vpop.eup %2469 }
0x15ae   :  { %974 = vrot.lane.b32.xlu0 %v2470_v18, %s2529_s5 }
0x1620   :  { %v975_v19 = vpop.permute.xlu0 %974 }
0x1621   :  { %v977_v20 = vmul.f32 %v2468_v11, %v975_v19 }
0x1623   :  { %979 = vrot.lane.b32.xlu0 %v977_v20, %s2530_s1 }
0x165a   :  { %v1299_v22 = vpop.f32.mrf.mxu1 }
0x165b   :  { %v1303_v23 = vadd.f32 %v1299_v22, %v1100_v21 }
0x165c   :  { %v2317_v24 = vpop.f32.mrf.mxu1 }
0x165d   :  { %2471 = vtanh.f32 %v1303_v23  ;;  %v2053_v28 = vmul.f32 -1.442695, %v1303_v23 }
0x165f   :  { %2473 = vpow2.f32 %v2053_v28 }
0x166a   :  { %v2472_v25 = vpop.eup %2471 }
0x166b   :  { %1313 = vrot.lane.b32.xlu1 %v2472_v25, %s2529_s5  ;;  %v1115_v25 = vadd.f32 %v2837_v51, %v2883_v47  ;;  %v1120_v47 = vadd.f32 %v2881_v46, %v2837_v51 }
0x166c   :  { %v2474_v29 = vpop.eup %2473 }
0x166d   :  { %v1307_v30 = vadd.f32 1.0, %v2474_v29 }
0x166f   :  { %2475 = vrcp.f32 %v1307_v30 }
0x167c   :  { %v2476_v31 = vpop.eup %2475 }
0x167d   :  { %v1311_v34 = vmul.f32 %v2476_v31, %v1221_v63 }
0x1695   :  { %v980_v26 = vpop.permute.xlu0 %979 }
0x1696   :  { %982 = vst.msk [vmem:[#allocation2 + $0x38] sm:$0xff] %vm165_vm2, %v980_v26 }
0x169d   :  { %v990_v27 = vld [vmem:[#allocation2 + $0x38] sm:$0xff] }
0x169e   :  { %2294 = vmatmul.mubr.msk.f32.gmra.mxu0 %vm165_vm2, %v990_v27 }
0x169f   :  { %2326 = vmatprep.mubr.msk.f32.mxu0 %vm2528_vm1, %v2527_v0 }
0x16dd   :  { %v1314_v32 = vpop.permute.xlu1 %1313 }
0x16de   :  { %v1316_v33 = vmul.f32 %v2476_v31, %v1314_v32 }
0x16e0   :  { %1318 = vrot.lane.b32.xlu1 %v1316_v33, %s2529_s5 }
0x1752   :  { %v1319_v35 = vpop.permute.xlu1 %1318 }
0x1753   :  { %v1321_v58 = vadd.f32 %v1319_v35, %v1311_v34 }
0x1755   :  { %2477 = vtanh.f32 %v1321_v58 }
0x175e   :  { %v2885_v48 = vpop.f32.mrf.mxu0 }
0x1760   :  { %v2887_v49 = vpop.f32.mrf.mxu0 }
0x1762   :  { %v2478_v36 = vpop.eup %2477 }
0x1763   :  { %1324 = vrot.lane.b32.xlu1 %v2478_v36, %s2529_s5 }
0x17d5   :  { %v1325_v41 = vpop.permute.xlu1 %1324 }
0x17d6   :  { %v1327_v42 = vmul.f32 %v2476_v31, %v1325_v41 }
0x17d8   :  { %1329 = vrot.lane.b32.xlu1 %v1327_v42, %s2530_s1 }
0x184a   :  { %v1330_v43 = vpop.permute.xlu1 %1329 }
0x184b   :  { %2327 = vmatmul.mubr.msk.f32.vlgmr.msra.gmra.mxu0 %vm165_vm2, %v1330_v43 }
0x184c   :  { %2341 = vmatpush3.msra.mxu0 %v2780_v37  ;;  %2348 = vmatprep.mubr.msk.f32.mxu0 %vm2528_vm1, %v2527_v0 }
0x184d   :  { %2342 = vmatprep.subr.mxu0 %v2527_v0 }
0x184e   :  { %2343 = vmatpush3.msra.mxu0 %v2786_v38 }
0x184f   :  { %2344 = vmatprep.subr.mxu0 %v2527_v0 }
0x1850   :  { %2345 = vmatpush3.msra.mxu0 %v2793_v39 }
0x1851   :  { %2346 = vmatprep.subr.mxu0 %v2527_v0 }
0x1852   :  { %2347 = vmatpush3.msra.mxu0 %v2800_v40 }
0x1853   :  { %2362 = vmatprep.subr.mxu0 %v2527_v0 }
0x190b   :  { %v1399_v52 = vpop.f32.mrf.mxu0 }
0x190c   :  { %v1403_v53 = vadd.f32 %v1399_v52, %v1105_v50 }
0x190d   :  { %v2328_v54 = vpop.f32.mrf.mxu0 }
0x190e   :  { %2479 = vtanh.f32 %v1403_v53  ;;  %v2055_v56 = vmul.f32 -1.442695, %v1403_v53 }
0x1910   :  { %2481 = vpow2.f32 %v2055_v56 }
0x191b   :  { %v2480_v2 = vpop.eup %2479 }
0x191c   :  { %1413 = vrot.lane.b32.xlu0 %v2480_v2, %s2529_s5 }
0x191d   :  { %v2482_v9 = vpop.eup %2481 }
0x191e   :  { %v1407_v57 = vadd.f32 1.0, %v2482_v9 }
0x1920   :  { %2483 = vrcp.f32 %v1407_v57 }
0x192d   :  { %v2484_v59 = vpop.eup %2483 }
0x192e   :  { %v1411_v5 = vmul.f32 %v2484_v59, %v1321_v58 }
0x198e   :  { %v1414_v60 = vpop.permute.xlu0 %1413 }
0x198f   :  { %v1416_v61 = vmul.f32 %v2484_v59, %v1414_v60 }
0x1991   :  { %1418 = vrot.lane.b32.xlu1 %v1416_v61, %s2529_s5 }
0x1a03   :  { %v1419_v62 = vpop.permute.xlu1 %1418 }
0x1a04   :  { %v1421_v6 = vadd.f32 %v1419_v62, %v1411_v5  ;;  %v1125_v62 = vadd.f32 %v2837_v51, %v2887_v49 }
0x1a06   :  { %2485 = vtanh.f32 %v1421_v6 }
0x1a13   :  { %v2486_v63 = vpop.eup %2485 }
0x1a14   :  { %1424 = vrot.lane.b32.xlu0 %v2486_v63, %s2529_s5 }
0x1a86   :  { %v1425_v1 = vpop.permute.xlu0 %1424 }
0x1a87   :  { %v1427_v7 = vmul.f32 %v2484_v59, %v1425_v1 }
0x1a89   :  { %1429 = vrot.lane.b32.xlu1 %v1427_v7, %s2530_s1 }
0x1afb   :  { %v1430_v3 = vpop.permute.xlu1 %1429 }
0x1afc   :  { %2338 = vmatmul.mubr.msk.f32.vlgmr.msra.gmra.mxu1 %vm165_vm2, %v1430_v3 }
0x1afd   :  { %2352 = vmatpush3.msra.mxu1 %v2780_v37  ;;  %2359 = vmatprep.mubr.msk.f32.mxu1 %vm2528_vm1, %v2527_v0 }
0x1afe   :  { %2353 = vmatprep.subr.mxu1 %v2527_v0 }
0x1aff   :  { %2354 = vmatpush3.msra.mxu1 %v2786_v38 }
0x1b00   :  { %2355 = vmatprep.subr.mxu1 %v2527_v0 }
0x1b01   :  { %2356 = vmatpush3.msra.mxu1 %v2793_v39 }
0x1b02   :  { %2357 = vmatprep.subr.mxu1 %v2527_v0 }
0x1b03   :  { %2358 = vmatpush3.msra.mxu1 %v2800_v40 }
0x1b04   :  { %2373 = vmatprep.subr.mxu1 %v2527_v0 }
0x1bbc   :  { %v1499_v55 = vpop.f32.mrf.mxu1 }
0x1bbd   :  { %v1503_v8 = vadd.f32 %v1499_v55, %v1110_v4 }
0x1bbe   :  { %v2339_v10 = vpop.f32.mrf.mxu1 }
0x1bbf   :  { %2487 = vtanh.f32 %v1503_v8  ;;  %v2057_v12 = vmul.f32 -1.442695, %v1503_v8 }
0x1bc1   :  { %2489 = vpow2.f32 %v2057_v12 }
0x1bcc   :  { %v2488_v11 = vpop.eup %2487 }
0x1bcd   :  { %1513 = vrot.lane.b32.xlu0 %v2488_v11, %s2529_s5 }
0x1bce   :  { %v2490_v13 = vpop.eup %2489 }
0x1bcf   :  { %v1507_v14 = vadd.f32 1.0, %v2490_v13 }
0x1bd1   :  { %2491 = vrcp.f32 %v1507_v14 }
0x1bde   :  { %v2492_v15 = vpop.eup %2491 }
0x1bdf   :  { %v1511_v18 = vmul.f32 %v2492_v15, %v1421_v6 }
0x1c3f   :  { %v1514_v16 = vpop.permute.xlu0 %1513 }
0x1c40   :  { %v1516_v17 = vmul.f32 %v2492_v15, %v1514_v16 }
0x1c42   :  { %1518 = vrot.lane.b32.xlu1 %v1516_v17, %s2529_s5 }
0x1cb4   :  { %v1519_v19 = vpop.permute.xlu1 %1518 }
0x1cb5   :  { %v1521_v20 = vadd.f32 %v1519_v19, %v1511_v18  ;;  %v1130_v18 = vadd.f32 %v2885_v48, %v2837_v51  ;;  %v1931_v48 = vld [vmem:[%s2984_s3 + $0x18] sm:$0xff] }
0x1cb7   :  { %2493 = vtanh.f32 %v1521_v20 }
0x1cc4   :  { %v2494_v21 = vpop.eup %2493 }
0x1cc5   :  { %1524 = vrot.lane.b32.xlu0 %v2494_v21, %s2529_s5 }
0x1d37   :  { %v1525_v22 = vpop.permute.xlu0 %1524 }
0x1d38   :  { %v1527_v23 = vmul.f32 %v2492_v15, %v1525_v22 }
0x1d3a   :  { %1529 = vrot.lane.b32.xlu1 %v1527_v23, %s2530_s1 }
0x1dac   :  { %v1530_v24 = vpop.permute.xlu1 %1529 }
0x1dad   :  { %2349 = vmatmul.mubr.msk.f32.vlgmr.msra.gmra.mxu0 %vm165_vm2, %v1530_v24 }
0x1dae   :  { %2363 = vmatpush3.msra.mxu0 %v2780_v37  ;;  %2370 = vmatprep.mubr.msk.f32.mxu0 %vm2528_vm1, %v2527_v0 }
0x1daf   :  { %2364 = vmatprep.subr.mxu0 %v2527_v0 }
0x1db0   :  { %2365 = vmatpush3.msra.mxu0 %v2786_v38 }
0x1db1   :  { %2366 = vmatprep.subr.mxu0 %v2527_v0 }
0x1db2   :  { %2367 = vmatpush3.msra.mxu0 %v2793_v39 }
0x1db3   :  { %2368 = vmatprep.subr.mxu0 %v2527_v0 }
0x1db4   :  { %2369 = vmatpush3.msra.mxu0 %v2800_v40 }
0x1db5   :  { %2384 = vmatprep.subr.mxu0 %v2527_v0 }
0x1e6d   :  { %v1599_v26 = vpop.f32.mrf.mxu0 }
0x1e6e   :  { %v1603_v27 = vadd.f32 %v1599_v26, %v1115_v25 }
0x1e6f   :  { %v2350_v28 = vpop.f32.mrf.mxu0 }
0x1e70   :  { %2495 = vtanh.f32 %v1603_v27  ;;  %v2059_v30 = vmul.f32 -1.442695, %v1603_v27 }
0x1e72   :  { %2497 = vpow2.f32 %v2059_v30 }
0x1e7d   :  { %v2496_v29 = vpop.eup %2495 }
0x1e7e   :  { %1613 = vrot.lane.b32.xlu0 %v2496_v29, %s2529_s5 }
0x1e7f   :  { %v2498_v31 = vpop.eup %2497 }
0x1e80   :  { %v1607_v32 = vadd.f32 1.0, %v2498_v31  ;;  %v1930_v31 = vld [vmem:[%s2984_s3 + $0x10] sm:$0xff] }
0x1e82   :  { %2499 = vrcp.f32 %v1607_v32  ;;  %v1929_v32 = vld [vmem:[%s2984_s3 + $0x8] sm:$0xff] }
0x1e8f   :  { %v2500_v33 = vpop.eup %2499 }
0x1e90   :  { %v1611_v58 = vmul.f32 %v2500_v33, %v1521_v20 }
0x1ef0   :  { %v1614_v34 = vpop.permute.xlu0 %1613 }
0x1ef1   :  { %v1616_v35 = vmul.f32 %v2500_v33, %v1614_v34 }
0x1ef3   :  { %1618 = vrot.lane.b32.xlu1 %v1616_v35, %s2529_s5 }
0x1f65   :  { %v1619_v36 = vpop.permute.xlu1 %1618 }
0x1f66   :  { %v1621_v41 = vadd.f32 %v1619_v36, %v1611_v58 }
0x1f68   :  { %2501 = vtanh.f32 %v1621_v41 }
0x1f75   :  { %v2502_v42 = vpop.eup %2501 }
0x1f76   :  { %1624 = vrot.lane.b32.xlu0 %v2502_v42, %s2529_s5 }
0x1fe8   :  { %v1625_v43 = vpop.permute.xlu0 %1624 }
0x1fe9   :  { %v1627_v44 = vmul.f32 %v2500_v33, %v1625_v43  ;;  %v1928_v33 = vld [vmem:[%s2984_s3] sm:$0xff] }
0x1feb   :  { %1629 = vrot.lane.b32.xlu1 %v1627_v44, %s2530_s1 }
0x205d   :  { %v1630_v45 = vpop.permute.xlu1 %1629 }
0x205e   :  { %2360 = vmatmul.mubr.msk.f32.vlgmr.msra.gmra.mxu1 %vm165_vm2, %v1630_v45 }
0x205f   :  { %2374 = vmatpush3.msra.mxu1 %v2780_v37  ;;  %2381 = vmatprep.mubr.msk.f32.mxu1 %vm2528_vm1, %v2527_v0 }
0x2060   :  { %2375 = vmatprep.subr.mxu1 %v2527_v0 }
0x2061   :  { %2376 = vmatpush3.msra.mxu1 %v2786_v38 }
0x2062   :  { %2377 = vmatprep.subr.mxu1 %v2527_v0 }
0x2063   :  { %2378 = vmatpush3.msra.mxu1 %v2793_v39 }
0x2064   :  { %2379 = vmatprep.subr.mxu1 %v2527_v0 }
0x2065   :  { %2380 = vmatpush3.msra.mxu1 %v2800_v40 }
0x211e   :  { %v1699_v50 = vpop.f32.mrf.mxu1 }
0x211f   :  { %v1703_v37 = vadd.f32 %v1699_v50, %v1120_v47 }
0x2120   :  { %v2361_v52 = vpop.f32.mrf.mxu1 }
0x2121   :  { %2503 = vtanh.f32 %v1703_v37  ;;  %v2061_v54 = vmul.f32 -1.442695, %v1703_v37 }
0x2123   :  { %2505 = vpow2.f32 %v2061_v54 }
0x212e   :  { %v2504_v53 = vpop.eup %2503 }
0x212f   :  { %1713 = vrot.lane.b32.xlu0 %v2504_v53, %s2529_s5 }
0x2130   :  { %v2506_v38 = vpop.eup %2505 }
0x2131   :  { %v1707_v2 = vadd.f32 1.0, %v2506_v38 }
0x2133   :  { %2507 = vrcp.f32 %v1707_v2 }
0x2140   :  { %v2508_v39 = vpop.eup %2507 }
0x2141   :  { %v1711_v40 = vmul.f32 %v2508_v39, %v1621_v41  ;;  %v2066_v41 = vld [vmem:[%s2984_s3 + $0x20] ss:$0 sm:$0xff] }
0x21a1   :  { %v1714_v56 = vpop.permute.xlu0 %1713 }
0x21a2   :  { %v1716_v9 = vmul.f32 %v2508_v39, %v1714_v56 }
0x21a4   :  { %1718 = vrot.lane.b32.xlu1 %v1716_v9, %s2529_s5 }
0x2216   :  { %v1719_v57 = vpop.permute.xlu1 %1718 }
0x2217   :  { %v1721_v46 = vadd.f32 %v1719_v57, %v1711_v40 }
0x2219   :  { %2509 = vtanh.f32 %v1721_v46 }
0x2226   :  { %v2510_v59 = vpop.eup %2509 }
0x2227   :  { %1724 = vrot.lane.b32.xlu0 %v2510_v59, %s2529_s5 }
0x2299   :  { %v1725_v60 = vpop.permute.xlu0 %1724 }
0x229a   :  { %v1727_v61 = vmul.f32 %v2508_v39, %v1725_v60 }
0x229c   :  { %1729 = vrot.lane.b32.xlu1 %v1727_v61, %s2530_s1 }
0x230e   :  { %v1730_v5 = vpop.permute.xlu1 %1729 }
0x230f   :  { %2371 = vmatmul.mubr.msk.f32.vlgmr.msra.gmra.mxu0 %vm165_vm2, %v1730_v5 }
0x2310   :  { %2392 = vmatprep.mubr.msk.f32.mxu0 %vm2528_vm1, %v2527_v0  ;;  %2385 = vmatpush3.msra.mxu0 %v1931_v48 }
0x2311   :  { %2386 = vmatprep.subr.mxu0 %v2527_v0 }
0x2312   :  { %2387 = vmatpush3.msra.mxu0 %v1930_v31 }
0x2313   :  { %2388 = vmatprep.subr.mxu0 %v2527_v0 }
0x2314   :  { %2389 = vmatpush3.msra.mxu0 %v1929_v32 }
0x2315   :  { %2390 = vmatprep.subr.mxu0 %v2527_v0 }
0x2316   :  { %2391 = vmatpush3.msra.mxu0 %v1928_v33 }
0x23cf   :  { %v1799_v6 = vpop.f32.mrf.mxu0 }
0x23d0   :  { %v1803_v63 = vadd.f32 %v1799_v6, %v1125_v62 }
0x23d1   :  { %v2372_v1 = vpop.f32.mrf.mxu0 }
0x23d2   :  { %2511 = vtanh.f32 %v1803_v63  ;;  %v2063_v3 = vmul.f32 -1.442695, %v1803_v63 }
0x23d4   :  { %2513 = vpow2.f32 %v2063_v3 }
0x23df   :  { %v2512_v7 = vpop.eup %2511 }
0x23e0   :  { %1813 = vrot.lane.b32.xlu0 %v2512_v7, %s2529_s5 }
0x23e1   :  { %v2514_v4 = vpop.eup %2513 }
0x23e2   :  { %v1807_v55 = vadd.f32 1.0, %v2514_v4 }
0x23e4   :  { %2515 = vrcp.f32 %v1807_v55 }
0x23f1   :  { %v2516_v8 = vpop.eup %2515 }
0x23f2   :  { %v1811_v12 = vmul.f32 %v2516_v8, %v1721_v46 }
0x2452   :  { %v1814_v10 = vpop.permute.xlu0 %1813 }
0x2453   :  { %v1816_v11 = vmul.f32 %v2516_v8, %v1814_v10 }
0x2455   :  { %1818 = vrot.lane.b32.xlu1 %v1816_v11, %s2529_s5 }
0x24c7   :  { %v1819_v13 = vpop.permute.xlu1 %1818 }
0x24c8   :  { %v1821_v49 = vadd.f32 %v1819_v13, %v1811_v12 }
0x24ca   :  { %2517 = vtanh.f32 %v1821_v49 }
0x24d7   :  { %v2518_v14 = vpop.eup %2517 }
0x24d8   :  { %1824 = vrot.lane.b32.xlu0 %v2518_v14, %s2529_s5 }
0x254a   :  { %v1825_v15 = vpop.permute.xlu0 %1824 }
0x254b   :  { %v1827_v16 = vmul.f32 %v2516_v8, %v1825_v15 }
0x254d   :  { %1829 = vrot.lane.b32.xlu1 %v1827_v16, %s2530_s1 }
0x25bf   :  { %v1830_v17 = vpop.permute.xlu1 %1829 }
0x25c0   :  { %2382 = vmatmul.mubr.msk.f32.vlgmr.msra.gmra.mxu1 %vm165_vm2, %v1830_v17 }
0x2680   :  { %v1899_v19 = vpop.f32.mrf.mxu1 }
0x2681   :  { %v1903_v20 = vadd.f32 %v1899_v19, %v1130_v18 }
0x2682   :  { %v2383_v21 = vpop.f32.mrf.mxu1 }
0x2683   :  { %2519 = vtanh.f32 %v1903_v20  ;;  %v2065_v23 = vmul.f32 -1.442695, %v1903_v20 }
0x2685   :  { %2521 = vpow2.f32 %v2065_v23 }
0x2690   :  { %v2520_v22 = vpop.eup %2519 }
0x2691   :  { %1913 = vrot.lane.b32.xlu0 %v2520_v22, %s2529_s5 }
0x2692   :  { %v2522_v24 = vpop.eup %2521 }
0x2693   :  { %v1907_v25 = vadd.f32 1.0, %v2522_v24 }
0x2695   :  { %2523 = vrcp.f32 %v1907_v25 }
0x26a2   :  { %v2524_v26 = vpop.eup %2523 }
0x26a3   :  { %v1911_v29 = vmul.f32 %v2524_v26, %v1821_v49 }
0x2703   :  { %v1914_v27 = vpop.permute.xlu0 %1913 }
0x2704   :  { %v1916_v28 = vmul.f32 %v2524_v26, %v1914_v27 }
0x2706   :  { %1918 = vrot.lane.b32.xlu1 %v1916_v28, %s2529_s5 }
0x2778   :  { %v1919_v30 = vpop.permute.xlu1 %1918 }
0x2779   :  { %v1921_v51 = vadd.f32 %v1919_v30, %v1911_v29 }
0x277b   :  { %2525 = vtanh.f32 %v1921_v51 }
0x2788   :  { %v2526_v34 = vpop.eup %2525 }
0x2789   :  { %1924 = vrot.lane.b32.xlu0 %v2526_v34, %s2529_s5 }
0x27fb   :  { %v1925_v35 = vpop.permute.xlu0 %1924 }
0x27fc   :  { %v1927_v58 = vmul.f32 %v2524_v26, %v1925_v35 }
0x27fe   :  { %1938 = vrot.lane.b32.xlu1 %v1927_v58, %s2530_s1 }
0x2870   :  { %v1939_v36 = vpop.permute.xlu1 %1938 }
0x2871   :  { %2393 = vmatmul.mubr.msk.f32.vlgmr.msra.gmra.mxu0 %vm165_vm2, %v1939_v36 }
0x2931   :  { %v2008_v42 = vpop.f32.mrf.mxu0 }
0x2932   :  { %v2009_v43 = vadd.f32 %v2066_v41, %v2008_v42 }
0x2933   :  { %v2394_v44 = vpop.f32.mrf.mxu0 }
0x2934   :  { %2013 = vst.msk [vmem:[%s2985_s4] sm:$0xff] %vm2012_vm3, %v2009_v43 }

</bundles_post_ra>
